<compile_context>
chip_gen: v5e
topology: v5e:2x2
jax: 0.10.0
libtpu: 0.0.40
codegen_flags: <defaults>
</compile_context>

<pallas_src>
import jax
import jax.numpy as jnp
from jax.experimental import pallas as pl
from jax.experimental.pallas import tpu as pltpu

EPS = 1e-5
LANE = 128       # channels are padded to a multiple of the lane width
SUBLANE = 8      # f32 sublane tile
# Set to jnp.bfloat16 on v6e/v7x for ~2x MXU throughput (accumulation stays f32);
# kept f32 here to match the PyTorch module's numerics.
MM_DTYPE = jnp.float32


def _round_up(x, m):
    return (x + m - 1) // m * m


def _pick_tile_h(H):
    assert H % SUBLANE == 0, "H must be a multiple of 8"
    for c in (64, 32, 16, 8):
        if H % c == 0 and H // c >= 2:
            return c
    return SUBLANE  # H == 8


# --------------------------------------------------------------------------- #
# Phase A: 3x3 conv on one spatial tile + per-tile BN partial statistics.
# --------------------------------------------------------------------------- #
def _conv_stage_kernel(xmain_ref, xhalo_ref, w_ref, conv_ref, stats_ref, acc_ref):
    """
    xmain_ref : (1, th, Wp, Cin_p)   rows [h*th, h*th+th) of the padded input
    xhalo_ref : (1, 8,  Wp, Cin_p)   rows [h*th+th, h*th+th+8) (only first 2 used)
    w_ref     : (3, 3, Cin_p, Cout_p) zero-padded HWIO conv weights
    conv_ref  : (1, th, W, Cout_p)   raw conv output tile (pre-BN / pre-ReLU)
    stats_ref : (1, 1, 2, Cout_p)    per-tile [sum, sum-of-squares] over (th, W)
    acc_ref   : (th*Wp, Cout_p) f32  VMEM scratch accumulator
    """
    _, th, Wp, Cin_p = xmain_ref.shape
    Cout_p = conv_ref.shape[-1]
    W = conv_ref.shape[2]
    M = th * Wp

    # (th + 2)-row input window: main tile + 2 halo rows from the block below.
    xwin = jnp.concatenate([xmain_ref[0], xhalo_ref[0, 0:2]], axis=0)

    acc_ref[...] = jnp.zeros_like(acc_ref)
    # 3x3 conv = 3 contiguous H-slabs x 3 lane-dense (M, Cin_p)x(Cin_p, Cout_p)
    # matmuls; the dx shift is applied to the matmul result with an XLU roll
    # (no strided-slice relayouts on the vld/vst path).
    for dy in range(3):
        slab = xwin[dy:dy + th].reshape(M, Cin_p)   # layout-friendly: Wp % 8 == 0
        slab = slab.astype(MM_DTYPE)
        for dx in range(3):
            z = jnp.dot(slab, w_ref[dy, dx].astype(MM_DTYPE),
                        preferred_element_type=jnp.float32)
            if dx:
                # acc[w] += z[w + dx]; circular wrap only lands in columns >= W,
                # which are dropped below (Wp >= W + 2).
                z = pltpu.roll(z, shift=M - dx, axis=0)
            acc_ref[...] += z

    valid = acc_ref[...].reshape(th, Wp, Cout_p)[:, 0:W, :]   # (th, W, Cout_p)
    conv_ref[0] = valid

    # Partial BatchNorm statistics for this tile (reduced across the grid outside,
    # so the global N*H*W statistics stay exact despite tiling).
    v2 = valid.reshape(th * W, Cout_p)
    stats_ref[0, 0, 0:1, :] = jnp.sum(v2, axis=0, keepdims=True)
    stats_ref[0, 0, 1:2, :] = jnp.sum(v2 * v2, axis=0, keepdims=True)


# --------------------------------------------------------------------------- #
# Phase B: folded BatchNorm affine + ReLU (lane-dense elementwise).
# --------------------------------------------------------------------------- #
def _bn_relu_kernel(y_ref, scale_ref, shift_ref, o_ref):
    o_ref[...] = jnp.maximum(y_ref[...] * scale_ref[0] + shift_ref[0], 0.0)


def conv_bn_relu_stage(x, w, gamma, beta):
    """One Conv2d(3x3, s=1, p=1) + BatchNorm2d(batch stats) + ReLU stage.

    x : (N, H, W, Cin_p) f32 with channels already zero-padded to a multiple of 128.
    w : (3, 3, Cin, Cout) f32 HWIO weights (unpadded).
    Returns (N, H, W, Cout_p) with Cout_p = round_up(Cout, 128); padded channels
    are exactly zero.  The Conv2d bias is intentionally omitted: training-mode
    BatchNorm's mean subtraction cancels it exactly.
    """
    N, H, W, Cin_p = x.shape
    Cin, Cout = w.shape[2], w.shape[3]
    assert Cin <= Cin_p
    Cout_p = _round_up(Cout, LANE)
    th = _pick_tile_h(H)
    n_h = H // th
    Wp = _round_up(W + 2, SUBLANE)
    hblk = th // SUBLANE

    # Single pad op: +1 halo row/col (top/left), zero-fill to (H+8, Wp) on the
    # bottom/right so the 8-row halo BlockSpec stays in bounds.
    xpad = jnp.pad(x, ((0, 0), (1, 7), (1, Wp - W - 1), (0, 0)))
    wp = jnp.pad(w, ((0, 0), (0, 0), (0, Cin_p - Cin), (0, Cout_p - Cout)))

    grid = (N, n_h)

    conv_out, stats = pl.pallas_call(
        _conv_stage_kernel,
        out_shape=(
            jax.ShapeDtypeStruct((N, H, W, Cout_p), jnp.float32),
            jax.ShapeDtypeStruct((N, n_h, 2, Cout_p), jnp.float32),
        ),
        grid=grid,
        in_specs=[
            pl.BlockSpec((1, th, Wp, Cin_p), lambda n, h: (n, h, 0, 0)),
            pl.BlockSpec((1, SUBLANE, Wp, Cin_p),
                         lambda n, h: (n, (h + 1) * hblk, 0, 0)),
            pl.BlockSpec((3, 3, Cin_p, Cout_p), lambda n, h: (0, 0, 0, 0)),
        ],
        out_specs=(
            pl.BlockSpec((1, th, W, Cout_p), lambda n, h: (n, h, 0, 0)),
            pl.BlockSpec((1, 1, 2, Cout_p), lambda n, h: (n, h, 0, 0)),
        ),
        scratch_shapes=[pltpu.VMEM((th * Wp, Cout_p), jnp.float32)],
        compiler_params=pltpu.CompilerParams(
            dimension_semantics=("parallel", "parallel"),
            vmem_limit_bytes=64 * 1024 * 1024,
        ),
        cost_estimate=pl.CostEstimate(
            flops=2 * 9 * N * H * Wp * Cin_p * Cout_p,
            transcendentals=0,
            bytes_accessed=4 * (xpad.size + wp.size + N * H * W * Cout_p),
        ),
    )(xpad, xpad, wp)

    # Global BatchNorm statistics (biased variance, training-mode semantics),
    # folded into a single per-channel scale/shift for phase B.
    cnt = jnp.float32(N * H * W)
    mean = jnp.sum(stats[:, :, 0, :], axis=(0, 1)) / cnt
    ex2 = jnp.sum(stats[:, :, 1, :], axis=(0, 1)) / cnt
    var = jnp.maximum(ex2 - mean * mean, 0.0)
    gamma_p = jnp.pad(gamma, (0, Cout_p - Cout))
    beta_p = jnp.pad(beta, (0, Cout_p - Cout))
    scale = gamma_p * jax.lax.rsqrt(var + EPS)
    shift = beta_p - mean * scale

    out = pl.pallas_call(
        _bn_relu_kernel,
        out_shape=jax.ShapeDtypeStruct((N, H, W, Cout_p), jnp.float32),
        grid=grid,
        in_specs=[
            pl.BlockSpec((1, th, W, Cout_p), lambda n, h: (n, h, 0, 0)),
            pl.BlockSpec((1, Cout_p), lambda n, h: (0, 0)),
            pl.BlockSpec((1, Cout_p), lambda n, h: (0, 0)),
        ],
        out_specs=pl.BlockSpec((1, th, W, Cout_p), lambda n, h: (n, h, 0, 0)),
        compiler_params=pltpu.CompilerParams(
            dimension_semantics=("parallel", "parallel")),
    )(conv_out, scale.reshape(1, Cout_p), shift.reshape(1, Cout_p))
    return out


def conv_block_forward_nhwc(x_nhwc, params):
    """conv_block forward in NHWC (preferred TPU layout; channel-padded internally)."""
    Cin = x_nhwc.shape[-1]
    Cin_p = _round_up(Cin, LANE)
    x = jnp.pad(x_nhwc.astype(jnp.float32),
                ((0, 0), (0, 0), (0, 0), (0, Cin_p - Cin)))
    x = conv_bn_relu_stage(x, params["w1"], params["g1"], params["be1"])
    x = conv_bn_relu_stage(x, params["w2"], params["g2"], params["be2"])
    return x[..., :params["w2"].shape[-1]]


@jax.jit
def conv_block_forward(x_nchw, params):
    # NCHW only at the PyTorch-parity boundary; everything inside is NHWC.
    x = jnp.transpose(x_nchw, (0, 2, 3, 1))
    y = conv_block_forward_nhwc(x, params)
    return jnp.transpose(y, (0, 3, 1, 2))


def init_conv_block_params(key, ch_in, ch_out):
    """Deterministic params matching the nn.Module's parameter shapes."""
    k1, k2, k3, k4 = jax.random.split(key, 4)

    def conv_init(kw, kb, cin, cout):
        fan_in = cin * 3 * 3
        bound = 1.0 / jnp.sqrt(float(fan_in))
        # PyTorch layout (Cout, Cin, 3, 3) -> kernel layout HWIO (3, 3, Cin, Cout)
        w_oihw = jax.random.uniform(kw, (cout, cin, 3, 3), jnp.float32,
                                    minval=-bound, maxval=bound)
        b = jax.random.uniform(kb, (cout,), jnp.float32,
                               minval=-bound, maxval=bound)
        return jnp.transpose(w_oihw, (2, 3, 1, 0)), b

    w1, b1 = conv_init(k1, k2, ch_in, ch_out)
    w2, b2 = conv_init(k3, k4, ch_out, ch_out)
    # BatchNorm2d default init: gamma = 1, beta = 0.
    return dict(w1=w1, b1=b1, g1=jnp.ones((ch_out,), jnp.float32),
                be1=jnp.zeros((ch_out,), jnp.float32),
                w2=w2, b2=b2, g2=jnp.ones((ch_out,), jnp.float32),
                be2=jnp.zeros((ch_out,), jnp.float32))


def _reference_conv_block(x_nchw, params):
    """Pure-XLA reference with identical training-mode BatchNorm semantics."""
    def stage(x, w, b, g, be):
        y = jax.lax.conv_general_dilated(
            x, w, window_strides=(1, 1), padding="SAME",
            dimension_numbers=("NHWC", "HWIO", "NHWC"),
            precision=jax.lax.Precision.HIGHEST) + b
        m = jnp.mean(y, axis=(0, 1, 2))
        v = jnp.mean((y - m) ** 2, axis=(0, 1, 2))
        y = (y - m) * jax.lax.rsqrt(v + EPS) * g + be
        return jnp.maximum(y, 0.0)

    x = jnp.transpose(x_nchw, (0, 2, 3, 1)).astype(jnp.float32)
    x = stage(x, params["w1"], params["b1"], params["g1"], params["be1"])
    x = stage(x, params["w2"], params["b2"], params["g2"], params["be2"])
    return jnp.transpose(x, (0, 3, 1, 2))


if __name__ == "__main__":
    ch_in, ch_out = 4, 8
    N, H, W = 2, 16, 16

    key = jax.random.PRNGKey(0)
    kx, kp = jax.random.split(key)
    x = jax.random.normal(kx, (N, ch_in, H, W), jnp.float32)  # NCHW, like PyTorch
    params = init_conv_block_params(kp, ch_in, ch_out)

    out = jax.block_until_ready(conv_block_forward(x, params))
    assert out.shape == (N, ch_out, H, W)
    assert bool(jnp.all(jnp.isfinite(out)))

    ref = jax.block_until_ready(_reference_conv_block(x, params))
    assert bool(jnp.allclose(out, ref, atol=5e-2, rtol=5e-2)), (
        "max |diff| = %f" % float(jnp.max(jnp.abs(out - ref))))
    print("KERNEL_OK")
</pallas_src>

<mosaic_0001>
module attributes {stable_mosaic.version = 11 : i64} {
  func.func @_conv_stage_kernel(%arg0: i32, %arg1: i32, %arg2: memref<1x8x24x128xf32, #tpu.memory_space<vmem>>, %arg3: memref<1x8x24x128xf32, #tpu.memory_space<vmem>>, %arg4: memref<3x3x128x128xf32, #tpu.memory_space<vmem>>, %arg5: memref<1x8x16x128xf32, #tpu.memory_space<vmem>>, %arg6: memref<1x1x2x128xf32, #tpu.memory_space<vmem>>, %arg7: memref<192x128xf32, #tpu.memory_space<vmem>>) attributes {dimension_semantics = [#tpu.dimension_semantics<parallel>, #tpu.dimension_semantics<parallel>], iteration_bounds = array<i64: 2, 2>, scalar_prefetch = 0 : i64, scratch_operands = 1 : i64, tpu.core_type = #tpu.core_type<tc>, window_params = [{transform_indices = @transform_0, window_bounds = array<i64: 1, 8, 24, 128>}, {transform_indices = @transform_1, window_bounds = array<i64: 1, 8, 24, 128>}, {pipeline_mode = #tpu.pipeline_mode<synchronous>, transform_indices = @transform_2, window_bounds = array<i64: 3, 3, 128, 128>}, {transform_indices = @transform_3, window_bounds = array<i64: 1, 8, 16, 128>}, {transform_indices = @transform_4, window_bounds = array<i64: 1, 1, 2, 128>}]} {
    %c0 = arith.constant 0 : index
    %c0_0 = arith.constant 0 : index
    %c0_1 = arith.constant 0 : index
    %c0_2 = arith.constant 0 : index
    %0 = vector.load %arg2[%c0, %c0_0, %c0_1, %c0_2] : memref<1x8x24x128xf32, #tpu.memory_space<vmem>>, vector<1x8x24x128xf32>
    %1 = vector.shape_cast %0 : vector<1x8x24x128xf32> to vector<8x24x128xf32>
    %c0_3 = arith.constant 0 : index
    %c0_4 = arith.constant 0 : index
    %c0_5 = arith.constant 0 : index
    %c0_6 = arith.constant 0 : index
    %2 = vector.load %arg3[%c0_3, %c0_4, %c0_5, %c0_6] : memref<1x8x24x128xf32, #tpu.memory_space<vmem>>, vector<1x2x24x128xf32>
    %3 = vector.shape_cast %2 : vector<1x2x24x128xf32> to vector<2x24x128xf32>
    %4 = tpu.concatenate %1, %3 in 0 : vector<8x24x128xf32>, vector<2x24x128xf32> -> vector<10x24x128xf32>
    %cst = arith.constant 0.000000e+00 : f32
    %5 = vector.broadcast %cst : f32 to vector<192x128xf32>
    %c0_7 = arith.constant 0 : index
    %c0_8 = arith.constant 0 : index
    %6 = vector.load %arg7[%c0_7, %c0_8] : memref<192x128xf32, #tpu.memory_space<vmem>>, vector<192x128xf32>
    tpu.vector_store %arg7[%c0_7, %c0_8], %5 {strides = array<i32>} : memref<192x128xf32, #tpu.memory_space<vmem>>, vector<192x128xf32>,
    %7 = vector.extract_strided_slice %4 {offsets = [0, 0, 0], sizes = [8, 24, 128], strides = [1, 1, 1]} : vector<10x24x128xf32> to vector<8x24x128xf32>
    %8 = vector.shape_cast %7 : vector<8x24x128xf32> to vector<192x128xf32>
    %c0_9 = arith.constant 0 : index
    %c0_10 = arith.constant 0 : index
    %c0_11 = arith.constant 0 : index
    %c0_12 = arith.constant 0 : index
    %9 = vector.load %arg4[%c0_9, %c0_10, %c0_11, %c0_12] : memref<3x3x128x128xf32, #tpu.memory_space<vmem>>, vector<1x1x128x128xf32>
    %10 = vector.shape_cast %9 : vector<1x1x128x128xf32> to vector<128x128xf32>
    %cst_13 = arith.constant dense<0.000000e+00> : vector<192x128xf32>
    %11 = tpu.matmul %8, %10, %cst_13 {dimension_numbers = #tpu.dot_dimension_numbers<[1], [0], [0], [1], [0, 0, 1, 1], [], []>} : vector<192x128xf32>, vector<128x128xf32>, vector<192x128xf32> -> vector<192x128xf32>
    %c0_14 = arith.constant 0 : index
    %c0_15 = arith.constant 0 : index
    %12 = vector.load %arg7[%c0_14, %c0_15] : memref<192x128xf32, #tpu.memory_space<vmem>>, vector<192x128xf32>
    %13 = arith.addf %12, %11 : vector<192x128xf32>
    %c0_16 = arith.constant 0 : index
    %c0_17 = arith.constant 0 : index
    %14 = vector.load %arg7[%c0_16, %c0_17] : memref<192x128xf32, #tpu.memory_space<vmem>>, vector<192x128xf32>
    tpu.vector_store %arg7[%c0_16, %c0_17], %13 {strides = array<i32>} : memref<192x128xf32, #tpu.memory_space<vmem>>, vector<192x128xf32>,
    %c0_18 = arith.constant 0 : index
    %c1 = arith.constant 1 : index
    %c0_19 = arith.constant 0 : index
    %c0_20 = arith.constant 0 : index
    %15 = vector.load %arg4[%c0_18, %c1, %c0_19, %c0_20] : memref<3x3x128x128xf32, #tpu.memory_space<vmem>>, vector<1x1x128x128xf32>
    %16 = vector.shape_cast %15 : vector<1x1x128x128xf32> to vector<128x128xf32>
    %cst_21 = arith.constant dense<0.000000e+00> : vector<192x128xf32>
    %17 = tpu.matmul %8, %16, %cst_21 {dimension_numbers = #tpu.dot_dimension_numbers<[1], [0], [0], [1], [0, 0, 1, 1], [], []>} : vector<192x128xf32>, vector<128x128xf32>, vector<192x128xf32> -> vector<192x128xf32>
    %c191_i32 = arith.constant 191 : i32
    %18 = tpu.dynamic_rotate %17 by %c191_i32 dim 0 : vector<192x128xf32>, i32 -> vector<192x128xf32>
    %c0_22 = arith.constant 0 : index
    %c0_23 = arith.constant 0 : index
    %19 = vector.load %arg7[%c0_22, %c0_23] : memref<192x128xf32, #tpu.memory_space<vmem>>, vector<192x128xf32>
    %20 = arith.addf %19, %18 : vector<192x128xf32>
    %c0_24 = arith.constant 0 : index
    %c0_25 = arith.constant 0 : index
    %21 = vector.load %arg7[%c0_24, %c0_25] : memref<192x128xf32, #tpu.memory_space<vmem>>, vector<192x128xf32>
    tpu.vector_store %arg7[%c0_24, %c0_25], %20 {strides = array<i32>} : memref<192x128xf32, #tpu.memory_space<vmem>>, vector<192x128xf32>,
    %c0_26 = arith.constant 0 : index
    %c2 = arith.constant 2 : index
    %c0_27 = arith.constant 0 : index
    %c0_28 = arith.constant 0 : index
    %22 = vector.load %arg4[%c0_26, %c2, %c0_27, %c0_28] : memref<3x3x128x128xf32, #tpu.memory_space<vmem>>, vector<1x1x128x128xf32>
    %23 = vector.shape_cast %22 : vector<1x1x128x128xf32> to vector<128x128xf32>
    %cst_29 = arith.constant dense<0.000000e+00> : vector<192x128xf32>
    %24 = tpu.matmul %8, %23, %cst_29 {dimension_numbers = #tpu.dot_dimension_numbers<[1], [0], [0], [1], [0, 0, 1, 1], [], []>} : vector<192x128xf32>, vector<128x128xf32>, vector<192x128xf32> -> vector<192x128xf32>
    %c190_i32 = arith.constant 190 : i32
    %25 = tpu.dynamic_rotate %24 by %c190_i32 dim 0 : vector<192x128xf32>, i32 -> vector<192x128xf32>
    %c0_30 = arith.constant 0 : index
    %c0_31 = arith.constant 0 : index
    %26 = vector.load %arg7[%c0_30, %c0_31] : memref<192x128xf32, #tpu.memory_space<vmem>>, vector<192x128xf32>
    %27 = arith.addf %26, %25 : vector<192x128xf32>
    %c0_32 = arith.constant 0 : index
    %c0_33 = arith.constant 0 : index
    %28 = vector.load %arg7[%c0_32, %c0_33] : memref<192x128xf32, #tpu.memory_space<vmem>>, vector<192x128xf32>
    tpu.vector_store %arg7[%c0_32, %c0_33], %27 {strides = array<i32>} : memref<192x128xf32, #tpu.memory_space<vmem>>, vector<192x128xf32>,
    %29 = vector.extract_strided_slice %4 {offsets = [1, 0, 0], sizes = [8, 24, 128], strides = [1, 1, 1]} : vector<10x24x128xf32> to vector<8x24x128xf32>
    %30 = vector.shape_cast %29 : vector<8x24x128xf32> to vector<192x128xf32>
    %c1_34 = arith.constant 1 : index
    %c0_35 = arith.constant 0 : index
    %c0_36 = arith.constant 0 : index
    %c0_37 = arith.constant 0 : index
    %31 = vector.load %arg4[%c1_34, %c0_35, %c0_36, %c0_37] : memref<3x3x128x128xf32, #tpu.memory_space<vmem>>, vector<1x1x128x128xf32>
    %32 = vector.shape_cast %31 : vector<1x1x128x128xf32> to vector<128x128xf32>
    %cst_38 = arith.constant dense<0.000000e+00> : vector<192x128xf32>
    %33 = tpu.matmul %30, %32, %cst_38 {dimension_numbers = #tpu.dot_dimension_numbers<[1], [0], [0], [1], [0, 0, 1, 1], [], []>} : vector<192x128xf32>, vector<128x128xf32>, vector<192x128xf32> -> vector<192x128xf32>
    %c0_39 = arith.constant 0 : index
    %c0_40 = arith.constant 0 : index
    %34 = vector.load %arg7[%c0_39, %c0_40] : memref<192x128xf32, #tpu.memory_space<vmem>>, vector<192x128xf32>
    %35 = arith.addf %34, %33 : vector<192x128xf32>
    %c0_41 = arith.constant 0 : index
    %c0_42 = arith.constant 0 : index
    %36 = vector.load %arg7[%c0_41, %c0_42] : memref<192x128xf32, #tpu.memory_space<vmem>>, vector<192x128xf32>
    tpu.vector_store %arg7[%c0_41, %c0_42], %35 {strides = array<i32>} : memref<192x128xf32, #tpu.memory_space<vmem>>, vector<192x128xf32>,
    %c1_43 = arith.constant 1 : index
    %c1_44 = arith.constant 1 : index
    %c0_45 = arith.constant 0 : index
    %c0_46 = arith.constant 0 : index
    %37 = vector.load %arg4[%c1_43, %c1_44, %c0_45, %c0_46] : memref<3x3x128x128xf32, #tpu.memory_space<vmem>>, vector<1x1x128x128xf32>
    %38 = vector.shape_cast %37 : vector<1x1x128x128xf32> to vector<128x128xf32>
    %cst_47 = arith.constant dense<0.000000e+00> : vector<192x128xf32>
    %39 = tpu.matmul %30, %38, %cst_47 {dimension_numbers = #tpu.dot_dimension_numbers<[1], [0], [0], [1], [0, 0, 1, 1], [], []>} : vector<192x128xf32>, vector<128x128xf32>, vector<192x128xf32> -> vector<192x128xf32>
    %c191_i32_48 = arith.constant 191 : i32
    %40 = tpu.dynamic_rotate %39 by %c191_i32_48 dim 0 : vector<192x128xf32>, i32 -> vector<192x128xf32>
    %c0_49 = arith.constant 0 : index
    %c0_50 = arith.constant 0 : index
    %41 = vector.load %arg7[%c0_49, %c0_50] : memref<192x128xf32, #tpu.memory_space<vmem>>, vector<192x128xf32>
    %42 = arith.addf %41, %40 : vector<192x128xf32>
    %c0_51 = arith.constant 0 : index
    %c0_52 = arith.constant 0 : index
    %43 = vector.load %arg7[%c0_51, %c0_52] : memref<192x128xf32, #tpu.memory_space<vmem>>, vector<192x128xf32>
    tpu.vector_store %arg7[%c0_51, %c0_52], %42 {strides = array<i32>} : memref<192x128xf32, #tpu.memory_space<vmem>>, vector<192x128xf32>,
    %c1_53 = arith.constant 1 : index
    %c2_54 = arith.constant 2 : index
    %c0_55 = arith.constant 0 : index
    %c0_56 = arith.constant 0 : index
    %44 = vector.load %arg4[%c1_53, %c2_54, %c0_55, %c0_56] : memref<3x3x128x128xf32, #tpu.memory_space<vmem>>, vector<1x1x128x128xf32>
    %45 = vector.shape_cast %44 : vector<1x1x128x128xf32> to vector<128x128xf32>
    %cst_57 = arith.constant dense<0.000000e+00> : vector<192x128xf32>
    %46 = tpu.matmul %30, %45, %cst_57 {dimension_numbers = #tpu.dot_dimension_numbers<[1], [0], [0], [1], [0, 0, 1, 1], [], []>} : vector<192x128xf32>, vector<128x128xf32>, vector<192x128xf32> -> vector<192x128xf32>
    %c190_i32_58 = arith.constant 190 : i32
    %47 = tpu.dynamic_rotate %46 by %c190_i32_58 dim 0 : vector<192x128xf32>, i32 -> vector<192x128xf32>
    %c0_59 = arith.constant 0 : index
    %c0_60 = arith.constant 0 : index
    %48 = vector.load %arg7[%c0_59, %c0_60] : memref<192x128xf32, #tpu.memory_space<vmem>>, vector<192x128xf32>
    %49 = arith.addf %48, %47 : vector<192x128xf32>
    %c0_61 = arith.constant 0 : index
    %c0_62 = arith.constant 0 : index
    %50 = vector.load %arg7[%c0_61, %c0_62] : memref<192x128xf32, #tpu.memory_space<vmem>>, vector<192x128xf32>
    tpu.vector_store %arg7[%c0_61, %c0_62], %49 {strides = array<i32>} : memref<192x128xf32, #tpu.memory_space<vmem>>, vector<192x128xf32>,
    %51 = vector.extract_strided_slice %4 {offsets = [2, 0, 0], sizes = [8, 24, 128], strides = [1, 1, 1]} : vector<10x24x128xf32> to vector<8x24x128xf32>
    %52 = vector.shape_cast %51 : vector<8x24x128xf32> to vector<192x128xf32>
    %c2_63 = arith.constant 2 : index
    %c0_64 = arith.constant 0 : index
    %c0_65 = arith.constant 0 : index
    %c0_66 = arith.constant 0 : index
    %53 = vector.load %arg4[%c2_63, %c0_64, %c0_65, %c0_66] : memref<3x3x128x128xf32, #tpu.memory_space<vmem>>, vector<1x1x128x128xf32>
    %54 = vector.shape_cast %53 : vector<1x1x128x128xf32> to vector<128x128xf32>
    %cst_67 = arith.constant dense<0.000000e+00> : vector<192x128xf32>
    %55 = tpu.matmul %52, %54, %cst_67 {dimension_numbers = #tpu.dot_dimension_numbers<[1], [0], [0], [1], [0, 0, 1, 1], [], []>} : vector<192x128xf32>, vector<128x128xf32>, vector<192x128xf32> -> vector<192x128xf32>
    %c0_68 = arith.constant 0 : index
    %c0_69 = arith.constant 0 : index
    %56 = vector.load %arg7[%c0_68, %c0_69] : memref<192x128xf32, #tpu.memory_space<vmem>>, vector<192x128xf32>
    %57 = arith.addf %56, %55 : vector<192x128xf32>
    %c0_70 = arith.constant 0 : index
    %c0_71 = arith.constant 0 : index
    %58 = vector.load %arg7[%c0_70, %c0_71] : memref<192x128xf32, #tpu.memory_space<vmem>>, vector<192x128xf32>
    tpu.vector_store %arg7[%c0_70, %c0_71], %57 {strides = array<i32>} : memref<192x128xf32, #tpu.memory_space<vmem>>, vector<192x128xf32>,
    %c2_72 = arith.constant 2 : index
    %c1_73 = arith.constant 1 : index
    %c0_74 = arith.constant 0 : index
    %c0_75 = arith.constant 0 : index
    %59 = vector.load %arg4[%c2_72, %c1_73, %c0_74, %c0_75] : memref<3x3x128x128xf32, #tpu.memory_space<vmem>>, vector<1x1x128x128xf32>
    %60 = vector.shape_cast %59 : vector<1x1x128x128xf32> to vector<128x128xf32>
    %cst_76 = arith.constant dense<0.000000e+00> : vector<192x128xf32>
    %61 = tpu.matmul %52, %60, %cst_76 {dimension_numbers = #tpu.dot_dimension_numbers<[1], [0], [0], [1], [0, 0, 1, 1], [], []>} : vector<192x128xf32>, vector<128x128xf32>, vector<192x128xf32> -> vector<192x128xf32>
    %c191_i32_77 = arith.constant 191 : i32
    %62 = tpu.dynamic_rotate %61 by %c191_i32_77 dim 0 : vector<192x128xf32>, i32 -> vector<192x128xf32>
    %c0_78 = arith.constant 0 : index
    %c0_79 = arith.constant 0 : index
    %63 = vector.load %arg7[%c0_78, %c0_79] : memref<192x128xf32, #tpu.memory_space<vmem>>, vector<192x128xf32>
    %64 = arith.addf %63, %62 : vector<192x128xf32>
    %c0_80 = arith.constant 0 : index
    %c0_81 = arith.constant 0 : index
    %65 = vector.load %arg7[%c0_80, %c0_81] : memref<192x128xf32, #tpu.memory_space<vmem>>, vector<192x128xf32>
    tpu.vector_store %arg7[%c0_80, %c0_81], %64 {strides = array<i32>} : memref<192x128xf32, #tpu.memory_space<vmem>>, vector<192x128xf32>,
    %c2_82 = arith.constant 2 : index
    %c2_83 = arith.constant 2 : index
    %c0_84 = arith.constant 0 : index
    %c0_85 = arith.constant 0 : index
    %66 = vector.load %arg4[%c2_82, %c2_83, %c0_84, %c0_85] : memref<3x3x128x128xf32, #tpu.memory_space<vmem>>, vector<1x1x128x128xf32>
    %67 = vector.shape_cast %66 : vector<1x1x128x128xf32> to vector<128x128xf32>
    %cst_86 = arith.constant dense<0.000000e+00> : vector<192x128xf32>
    %68 = tpu.matmul %52, %67, %cst_86 {dimension_numbers = #tpu.dot_dimension_numbers<[1], [0], [0], [1], [0, 0, 1, 1], [], []>} : vector<192x128xf32>, vector<128x128xf32>, vector<192x128xf32> -> vector<192x128xf32>
    %c190_i32_87 = arith.constant 190 : i32
    %69 = tpu.dynamic_rotate %68 by %c190_i32_87 dim 0 : vector<192x128xf32>, i32 -> vector<192x128xf32>
    %c0_88 = arith.constant 0 : index
    %c0_89 = arith.constant 0 : index
    %70 = vector.load %arg7[%c0_88, %c0_89] : memref<192x128xf32, #tpu.memory_space<vmem>>, vector<192x128xf32>
    %71 = arith.addf %70, %69 : vector<192x128xf32>
    %c0_90 = arith.constant 0 : index
    %c0_91 = arith.constant 0 : index
    %72 = vector.load %arg7[%c0_90, %c0_91] : memref<192x128xf32, #tpu.memory_space<vmem>>, vector<192x128xf32>
    tpu.vector_store %arg7[%c0_90, %c0_91], %71 {strides = array<i32>} : memref<192x128xf32, #tpu.memory_space<vmem>>, vector<192x128xf32>,
    %c0_92 = arith.constant 0 : index
    %c0_93 = arith.constant 0 : index
    %73 = vector.load %arg7[%c0_92, %c0_93] : memref<192x128xf32, #tpu.memory_space<vmem>>, vector<192x128xf32>
    %74 = vector.shape_cast %73 : vector<192x128xf32> to vector<8x24x128xf32>
    %75 = vector.extract_strided_slice %74 {offsets = [0, 0, 0], sizes = [8, 16, 128], strides = [1, 1, 1]} : vector<8x24x128xf32> to vector<8x16x128xf32>
    %c0_94 = arith.constant 0 : index
    %c0_95 = arith.constant 0 : index
    %c0_96 = arith.constant 0 : index
    %c0_97 = arith.constant 0 : index
    %76 = vector.load %arg5[%c0_94, %c0_95, %c0_96, %c0_97] : memref<1x8x16x128xf32, #tpu.memory_space<vmem>>, vector<1x8x16x128xf32>
    %77 = vector.shape_cast %76 : vector<1x8x16x128xf32> to vector<8x16x128xf32>
    %78 = vector.shape_cast %75 : vector<8x16x128xf32> to vector<1x8x16x128xf32>
    tpu.vector_store %arg5[%c0_94, %c0_95, %c0_96, %c0_97], %78 {strides = array<i32>} : memref<1x8x16x128xf32, #tpu.memory_space<vmem>>, vector<1x8x16x128xf32>,
    %79 = vector.shape_cast %75 : vector<8x16x128xf32> to vector<128x128xf32>
    %cst_98 = arith.constant dense<0.000000e+00> : vector<128xf32>
    %80 = vector.multi_reduction <add>, %79, %cst_98 [0] : vector<128x128xf32> to vector<128xf32>
    %81 = vector.shape_cast %80 : vector<128xf32> to vector<1x128xf32>
    %c0_99 = arith.constant 0 : index
    %c0_100 = arith.constant 0 : index
    %c0_101 = arith.constant 0 : index
    %c0_102 = arith.constant 0 : index
    %82 = vector.load %arg6[%c0_99, %c0_100, %c0_101, %c0_102] : memref<1x1x2x128xf32, #tpu.memory_space<vmem>>, vector<1x1x1x128xf32>
    %83 = vector.shape_cast %82 : vector<1x1x1x128xf32> to vector<1x128xf32>
    %84 = vector.shape_cast %81 : vector<1x128xf32> to vector<1x1x1x128xf32>
    tpu.vector_store %arg6[%c0_99, %c0_100, %c0_101, %c0_102], %84 {strides = array<i32>} : memref<1x1x2x128xf32, #tpu.memory_space<vmem>>, vector<1x1x1x128xf32>,
    %85 = arith.mulf %79, %79 : vector<128x128xf32>
    %cst_103 = arith.constant dense<0.000000e+00> : vector<128xf32>
    %86 = vector.multi_reduction <add>, %85, %cst_103 [0] : vector<128x128xf32> to vector<128xf32>
    %87 = vector.shape_cast %86 : vector<128xf32> to vector<1x128xf32>
    %c0_104 = arith.constant 0 : index
    %c0_105 = arith.constant 0 : index
    %c1_106 = arith.constant 1 : index
    %c0_107 = arith.constant 0 : index
    %88 = vector.load %arg6[%c0_104, %c0_105, %c1_106, %c0_107] : memref<1x1x2x128xf32, #tpu.memory_space<vmem>>, vector<1x1x1x128xf32>
    %89 = vector.shape_cast %88 : vector<1x1x1x128xf32> to vector<1x128xf32>
    %90 = vector.shape_cast %87 : vector<1x128xf32> to vector<1x1x1x128xf32>
    tpu.vector_store %arg6[%c0_104, %c0_105, %c1_106, %c0_107], %90 {strides = array<i32>} : memref<1x1x2x128xf32, #tpu.memory_space<vmem>>, vector<1x1x1x128xf32>,
    return
  }
  func.func @transform_0(%arg0: i32, %arg1: i32) -> (i32, i32, i32, i32) {
    %c0_i32 = arith.constant 0 : i32
    %c0_i32_0 = arith.constant 0 : i32
    %c0_i32_1 = arith.constant 0 : i32
    return %arg0, %arg1, %c0_i32, %c0_i32_0 : i32, i32, i32, i32
  }
  func.func @transform_1(%arg0: i32, %arg1: i32) -> (i32, i32, i32, i32) {
    %c1_i32 = arith.constant 1 : i32
    %0 = arith.addi %arg1, %c1_i32 : i32
    %c1_i32_0 = arith.constant 1 : i32
    %1 = arith.muli %0, %c1_i32_0 : i32
    %c0_i32 = arith.constant 0 : i32
    %c0_i32_1 = arith.constant 0 : i32
    %c0_i32_2 = arith.constant 0 : i32
    return %arg0, %1, %c0_i32, %c0_i32_1 : i32, i32, i32, i32
  }
  func.func @transform_2(%arg0: i32, %arg1: i32) -> (i32, i32, i32, i32) {
    %c0_i32 = arith.constant 0 : i32
    %c0_i32_0 = arith.constant 0 : i32
    %c0_i32_1 = arith.constant 0 : i32
    %c0_i32_2 = arith.constant 0 : i32
    %c0_i32_3 = arith.constant 0 : i32
    return %c0_i32, %c0_i32_0, %c0_i32_1, %c0_i32_2 : i32, i32, i32, i32
  }
  func.func @transform_3(%arg0: i32, %arg1: i32) -> (i32, i32, i32, i32) {
    %c0_i32 = arith.constant 0 : i32
    %c0_i32_0 = arith.constant 0 : i32
    %c0_i32_1 = arith.constant 0 : i32
    return %arg0, %arg1, %c0_i32, %c0_i32_0 : i32, i32, i32, i32
  }
  func.func @transform_4(%arg0: i32, %arg1: i32) -> (i32, i32, i32, i32) {
    %c0_i32 = arith.constant 0 : i32
    %c0_i32_0 = arith.constant 0 : i32
    %c0_i32_1 = arith.constant 0 : i32
    return %arg0, %arg1, %c0_i32, %c0_i32_0 : i32, i32, i32, i32
  }
}

module attributes {stable_mosaic.version = 11 : i64} {
  func.func @_bn_relu_kernel(%arg0: i32, %arg1: i32, %arg2: memref<1x8x16x128xf32, #tpu.memory_space<vmem>>, %arg3: memref<1x128xf32, #tpu.memory_space<vmem>>, %arg4: memref<1x128xf32, #tpu.memory_space<vmem>>, %arg5: memref<1x8x16x128xf32, #tpu.memory_space<vmem>>) attributes {dimension_semantics = [#tpu.dimension_semantics<parallel>, #tpu.dimension_semantics<parallel>], iteration_bounds = array<i64: 2, 2>, scalar_prefetch = 0 : i64, scratch_operands = 0 : i64, tpu.core_type = #tpu.core_type<tc>, window_params = [{transform_indices = @transform_0, window_bounds = array<i64: 1, 8, 16, 128>}, {pipeline_mode = #tpu.pipeline_mode<synchronous>, transform_indices = @transform_1, window_bounds = array<i64: 1, 128>}, {pipeline_mode = #tpu.pipeline_mode<synchronous>, transform_indices = @transform_2, window_bounds = array<i64: 1, 128>}, {transform_indices = @transform_3, window_bounds = array<i64: 1, 8, 16, 128>}]} {
    %c0 = arith.constant 0 : index
    %c0_0 = arith.constant 0 : index
    %c0_1 = arith.constant 0 : index
    %c0_2 = arith.constant 0 : index
    %0 = vector.load %arg2[%c0, %c0_0, %c0_1, %c0_2] : memref<1x8x16x128xf32, #tpu.memory_space<vmem>>, vector<1x8x16x128xf32>
    %c0_3 = arith.constant 0 : index
    %c0_4 = arith.constant 0 : index
    %1 = vector.load %arg3[%c0_3, %c0_4] : memref<1x128xf32, #tpu.memory_space<vmem>>, vector<1x128xf32>
    %2 = vector.shape_cast %1 : vector<1x128xf32> to vector<128xf32>
    %3 = vector.shape_cast %2 : vector<128xf32> to vector<1x1x1x128xf32>
    %4 = vector.broadcast %3 : vector<1x1x1x128xf32> to vector<1x8x16x128xf32>
    %5 = arith.mulf %0, %4 : vector<1x8x16x128xf32>
    %c0_5 = arith.constant 0 : index
    %c0_6 = arith.constant 0 : index
    %6 = vector.load %arg4[%c0_5, %c0_6] : memref<1x128xf32, #tpu.memory_space<vmem>>, vector<1x128xf32>
    %7 = vector.shape_cast %6 : vector<1x128xf32> to vector<128xf32>
    %8 = vector.shape_cast %7 : vector<128xf32> to vector<1x1x1x128xf32>
    %9 = vector.broadcast %8 : vector<1x1x1x128xf32> to vector<1x8x16x128xf32>
    %10 = arith.addf %5, %9 : vector<1x8x16x128xf32>
    %cst = arith.constant 0.000000e+00 : f32
    %11 = vector.broadcast %cst : f32 to vector<1x8x16x128xf32>
    %12 = arith.maximumf %10, %11 : vector<1x8x16x128xf32>
    %c0_7 = arith.constant 0 : index
    %c0_8 = arith.constant 0 : index
    %c0_9 = arith.constant 0 : index
    %c0_10 = arith.constant 0 : index
    %13 = vector.load %arg5[%c0_7, %c0_8, %c0_9, %c0_10] : memref<1x8x16x128xf32, #tpu.memory_space<vmem>>, vector<1x8x16x128xf32>
    tpu.vector_store %arg5[%c0_7, %c0_8, %c0_9, %c0_10], %12 {strides = array<i32>} : memref<1x8x16x128xf32, #tpu.memory_space<vmem>>, vector<1x8x16x128xf32>,
    return
  }
  func.func @transform_0(%arg0: i32, %arg1: i32) -> (i32, i32, i32, i32) {
    %c0_i32 = arith.constant 0 : i32
    %c0_i32_0 = arith.constant 0 : i32
    %c0_i32_1 = arith.constant 0 : i32
    return %arg0, %arg1, %c0_i32, %c0_i32_0 : i32, i32, i32, i32
  }
  func.func @transform_1(%arg0: i32, %arg1: i32) -> (i32, i32) {
    %c0_i32 = arith.constant 0 : i32
    %c0_i32_0 = arith.constant 0 : i32
    %c0_i32_1 = arith.constant 0 : i32
    return %c0_i32, %c0_i32_0 : i32, i32
  }
  func.func @transform_2(%arg0: i32, %arg1: i32) -> (i32, i32) {
    %c0_i32 = arith.constant 0 : i32
    %c0_i32_0 = arith.constant 0 : i32
    %c0_i32_1 = arith.constant 0 : i32
    return %c0_i32, %c0_i32_0 : i32, i32
  }
  func.func @transform_3(%arg0: i32, %arg1: i32) -> (i32, i32, i32, i32) {
    %c0_i32 = arith.constant 0 : i32
    %c0_i32_0 = arith.constant 0 : i32
    %c0_i32_1 = arith.constant 0 : i32
    return %arg0, %arg1, %c0_i32, %c0_i32_0 : i32, i32, i32, i32
  }
}

</mosaic_0001>

<bundles_post_ra>
// kernel: conv_block_forward.5
= control target key start
LH: loop header
LB: loop body
LE: loop exit
PB: predicated region body
PF: predicated region fallthrough
CT: control target
= control target key end

     0   :  { %s519_s12 = smov 0   ;;  %s521_s13 = smov 0   ;;  %s630_s0 = inlined_call_operand.vmem [shape: f32[2,16,16,128], index: 0, kind: input, shape index: {}]   ;;  %s631_s1 = inlined_call_operand.vmem [shape: f32[1,128], index: 1, kind: input, shape index: {}]   ;;  %s632_s2 = inlined_call_operand.vmem [shape: f32[1,128], index: 2, kind: input, shape index: {}]   ;;  %s633_s3 = inlined_call_operand.vmem [shape: f32[2,16,16,128], index: 3, kind: output, shape index: {}]  }
   0x1   :  { %s523_s14 = smov 0   ;;  %s525_s15 = smov 0  }
   0x2   :  { %s527_s16 = smov 0  }
   0x3 LB: > { %s22_s17 = sadd.s32 1, %s489_s14  ;;  %s25_s18 = sadd.s32 1, %s493_s15  ;;  %s497_s16 = sphi %s527_s16, %s13_s16   ;;  %s493_s15 = sphi %s525_s15, %s637_s15   ;;  %s489_s14 = sphi %s523_s14, %s636_s14   ;;  %s485_s13 = sphi %s521_s13, %s635_s13   ;;  %s481_s12 = sphi %s519_s12, %s634_s12  }
   0x4   : > { %p23_p0 = scmp.ge.s32.totalorder %s22_s17, 2  ;;  %p406_p1 = scmp.ge.s32.totalorder %s497_s16, 1 }
   0x5   : > { %p159_p2 = scmp.lt.s32.totalorder %s497_s16, 5 }
   0x6   : > { %s639_s17 = smov (%p23_p0, %s22_s17), 0  ;;  %s641_s18 = smov (!%p23_p0, %s25_s18), %s493_s15 }
   0x7   : > { %p160_p3 = pnand %p406_p1, %p159_p2  ;;  %p27_p4 = scmp.ge.s32.totalorder %s641_s18, 2 }
   0x8   : > { %s407_s19 = sshll.u32 (!%p160_p3), %s481_s12, 3  ;;  %p194_p5 = scmp.lt.s32.totalorder (!%p160_p3), %s485_s13, 1 }
   0x9   : > { %s643_s18 = smov (%p27_p4, %s641_s18), 0  ;;  %163 = sbr.rel (%p160_p3) target bundleno = 42 (0x2a), region = 32 }
   0xa   : > { %p196_p6 = scmp.lt.s32.totalorder (!%p160_p3), %s407_s19, 15 }
   0xe   : > { %s645_s13 = smov (!%p194_p5, %s485_s13), 1  ;;  %s647_s19 = smov (!%p196_p6, %s407_s19), 15  ;;  %v457_v0 = vld [vmem:[%s631_s1] ss:$0 sm:$0xff] }
   0xf   : > { %s409_s20 = sshll.u32 %s645_s13, 5  ;;  %s408_s21 = sshll.u32 %s647_s19, 1  ;;  %v560_v1 = vld [vmem:[%s632_s2] ss:$0 sm:$0xff] }
  0x10   : > { %s200_s22 = sadd.s32 %s409_s20, %s408_s21 }
  0x11   : > { %s410_s25 = sshll.u32 %s200_s22, 3 }
  0x12   : > { %s555_s28 = scalar_lea.vmem %s630_s0, %s410_s25  ;;  %s576_s6 = scalar_lea.vmem %s633_s3, %s410_s25 }
  0x13   : > { %v215_v2 = vld [vmem:[%s555_s28] sm:$0xff]  ;;  %v216_v3 = vld [vmem:[%s555_s28 + $0x8] sm:$0xff]  ;;  %v217_v4 = vld [vmem:[%s555_s28 + $0x10] sm:$0xff] }
  0x14   : > { %v235_v5 = vmul.f32 %v457_v0, %v215_v2  ;;  %v236_v6 = vmul.f32 %v457_v0, %v216_v3  ;;  %v237_v7 = vmul.f32 %v457_v0, %v217_v4  ;;  %v218_v8 = vld [vmem:[%s555_s28 + $0x18] sm:$0xff]  ;;  %v219_v9 = vld [vmem:[%s555_s28 + $0x20] sm:$0xff]  ;;  %v220_v10 = vld [vmem:[%s555_s28 + $0x28] sm:$0xff] }
  0x15   : > { %v238_v11 = vmul.f32 %v457_v0, %v218_v8  ;;  %v239_v12 = vmul.f32 %v457_v0, %v219_v9  ;;  %v240_v13 = vmul.f32 %v457_v0, %v220_v10  ;;  %v221_v14 = vld [vmem:[%s555_s28 + $0x30] sm:$0xff]  ;;  %v222_v15 = vld [vmem:[%s555_s28 + $0x38] sm:$0xff]  ;;  %v223_v24 = vld [vmem:[%s555_s28 + $0x40] sm:$0xff] }
  0x16   : > { %v255_v16 = vadd.f32 %v560_v1, %v235_v5  ;;  %v256_v17 = vadd.f32 %v560_v1, %v236_v6  ;;  %v257_v18 = vadd.f32 %v560_v1, %v237_v7  ;;  %v241_v19 = vmul.f32 %v457_v0, %v221_v14  ;;  %v224_v25 = vld [vmem:[%s555_s28 + $0x48] sm:$0xff]  ;;  %v225_v26 = vld [vmem:[%s555_s28 + $0x50] sm:$0xff]  ;;  %v226_v31 = vld [vmem:[%s555_s28 + $0x58] sm:$0xff] }
  0x17   : > { %v258_v20 = vadd.f32 %v560_v1, %v238_v11  ;;  %v259_v21 = vadd.f32 %v560_v1, %v239_v12  ;;  %v260_v22 = vadd.f32 %v560_v1, %v240_v13  ;;  %v242_v23 = vmul.f32 %v457_v0, %v222_v15  ;;  %v227_v32 = vld [vmem:[%s555_s28 + $0x60] sm:$0xff]  ;;  %v228_v33 = vld [vmem:[%s555_s28 + $0x68] sm:$0xff]  ;;  %v229_v37 = vld [vmem:[%s555_s28 + $0x70] sm:$0xff] }
  0x18   : > { %v271_v27 = vmax.f32 %v255_v16, 0.0  ;;  %v272_v28 = vmax.f32 %v256_v17, 0.0  ;;  %v273_v29 = vmax.f32 %v257_v18, 0.0  ;;  %v261_v30 = vadd.f32 %v560_v1, %v241_v19  ;;  %v230_v42 = vld [vmem:[%s555_s28 + $0x78] sm:$0xff] }
  0x19   : > { %v274_v34 = vmax.f32 %v258_v20, 0.0  ;;  %v275_v35 = vmax.f32 %v259_v21, 0.0  ;;  %v262_v36 = vadd.f32 %v560_v1, %v242_v23  ;;  %v276_v38 = vmax.f32 %v260_v22, 0.0 }
  0x1a   : > { %287 = vst [vmem:[%s576_s6] sm:$0xff] %v271_v27  ;;  %v243_v39 = vmul.f32 %v457_v0, %v223_v24  ;;  %v244_v40 = vmul.f32 %v457_v0, %v224_v25  ;;  %v245_v41 = vmul.f32 %v457_v0, %v225_v26  ;;  %v277_v43 = vmax.f32 %v261_v30, 0.0 }
  0x1b   : > { %288 = vst [vmem:[%s576_s6 + $0x8] sm:$0xff] %v272_v28  ;;  %v246_v44 = vmul.f32 %v457_v0, %v226_v31  ;;  %v247_v45 = vmul.f32 %v457_v0, %v227_v32  ;;  %v248_v46 = vmul.f32 %v457_v0, %v228_v33  ;;  %v249_v50 = vmul.f32 %v457_v0, %v229_v37 }
  0x1c   : > { %289 = vst [vmem:[%s576_s6 + $0x10] sm:$0xff] %v273_v29  ;;  %v263_v47 = vadd.f32 %v560_v1, %v243_v39  ;;  %v264_v48 = vadd.f32 %v560_v1, %v244_v40  ;;  %v265_v49 = vadd.f32 %v560_v1, %v245_v41  ;;  %v278_v51 = vmax.f32 %v262_v36, 0.0 }
  0x1d   : > { %290 = vst [vmem:[%s576_s6 + $0x18] sm:$0xff] %v274_v34  ;;  %v266_v52 = vadd.f32 %v560_v1, %v246_v44  ;;  %v250_v53 = vmul.f32 %v457_v0, %v230_v42  ;;  %v267_v55 = vadd.f32 %v560_v1, %v247_v45  ;;  %v268_v57 = vadd.f32 %v560_v1, %v248_v46 }
  0x1e   : > { %291 = vst [vmem:[%s576_s6 + $0x20] sm:$0xff] %v275_v35  ;;  %v279_v54 = vmax.f32 %v263_v47, 0.0  ;;  %v280_v56 = vmax.f32 %v264_v48, 0.0  ;;  %v281_v58 = vmax.f32 %v265_v49, 0.0  ;;  %v269_v59 = vadd.f32 %v560_v1, %v249_v50 }
  0x1f   : > { %292 = vst [vmem:[%s576_s6 + $0x28] sm:$0xff] %v276_v38  ;;  %v282_v60 = vmax.f32 %v266_v52, 0.0  ;;  %v270_v61 = vadd.f32 %v560_v1, %v250_v53  ;;  %v283_v62 = vmax.f32 %v267_v55, 0.0  ;;  %v284_v63 = vmax.f32 %v268_v57, 0.0 }
  0x20   : > { %293 = vst [vmem:[%s576_s6 + $0x30] sm:$0xff] %v277_v43  ;;  %v285_v0 = vmax.f32 %v269_v59, 0.0 }
  0x21   : > { %294 = vst [vmem:[%s576_s6 + $0x38] sm:$0xff] %v278_v51  ;;  %v286_v2 = vmax.f32 %v270_v61, 0.0 }
  0x22   : > { %295 = vst [vmem:[%s576_s6 + $0x40] sm:$0xff] %v279_v54 }
  0x23   : > { %296 = vst [vmem:[%s576_s6 + $0x48] sm:$0xff] %v280_v56 }
  0x24   : > { %297 = vst [vmem:[%s576_s6 + $0x50] sm:$0xff] %v281_v58 }
  0x25   : > { %298 = vst [vmem:[%s576_s6 + $0x58] sm:$0xff] %v282_v60 }
  0x26   : > { %299 = vst [vmem:[%s576_s6 + $0x60] sm:$0xff] %v283_v62 }
  0x27   : > { %300 = vst [vmem:[%s576_s6 + $0x68] sm:$0xff] %v284_v63 }
  0x28   : > { %301 = vst [vmem:[%s576_s6 + $0x70] sm:$0xff] %v285_v0 }
  0x29   : > { %302 = vst [vmem:[%s576_s6 + $0x78] sm:$0xff] %v286_v2 }
  0x2a PF: > { %s13_s16 = sadd.s32 1, %s497_s16   ;;  %s634_s12 = smov %s489_s14 }
  0x2b   : > { %p10_p7 = scmp.ge.s32.totalorder %s13_s16, 6   ;;  %s635_s13 = smov %s493_s15 }
  0x2c   : > { %s636_s14 = smov %s639_s17  ;;  %s637_s15 = smov %s643_s18 }
  0x2d   :  { %12 = sbr.rel (!%p10_p7) target bundleno = 3 (0x3), region = 62 }

// kernel: conv_block_forward.4
= control target key start
LH: loop header
LB: loop body
LE: loop exit
PB: predicated region body
PF: predicated region fallthrough
CT: control target
= control target key end

     0   :  { %s2833_s15 = smov 0   ;;  %s2835_s16 = smov 0   ;;  %s3994_s0 = inlined_call_operand.vmem [shape: f32[2,24,24,128], index: 0, kind: input, shape index: {}, may-alias: {0,1}]   ;;  %s3995_s1 = inlined_call_operand.vmem [shape: f32[2,24,24,128], index: 1, kind: input, shape index: {}, may-alias: {0,1}]   ;;  %s3996_s2 = inlined_call_operand.vmem [shape: f32[3,3,128,128], index: 2, kind: input, shape index: {}]   ;;  %s3997_s3 = inlined_call_operand.vmem [shape: f32[2,16,16,128], index: 3, kind: output, shape index: {0}]   ;;  %s3998_s4 = inlined_call_operand.vmem [shape: f32[2,2,2,128], index: 4, kind: output, shape index: {1}]  }
   0x1   :  { %s2837_s17 = smov 0   ;;  %s2839_s18 = smov 0  }
   0x2   :  { %s2841_s19 = smov 0  }
   0x3 LB: > { %s24_s20 = sadd.s32 1, %s2798_s17  ;;  %s27_s21 = sadd.s32 1, %s2802_s18  ;;  %s2806_s19 = sphi %s2841_s19, %s15_s19   ;;  %s2802_s18 = sphi %s2839_s18, %s4004_s18   ;;  %s2798_s17 = sphi %s2837_s17, %s4003_s17   ;;  %s2794_s16 = sphi %s2835_s16, %s4002_s16   ;;  %s2790_s15 = sphi %s2833_s15, %s4001_s15  }
   0x4   : > { %p25_p0 = scmp.ge.s32.totalorder %s24_s20, 2  ;;  %p2519_p1 = scmp.ge.s32.totalorder %s2806_s19, 1 }
   0x5   : > { %p211_p2 = scmp.lt.s32.totalorder %s2806_s19, 5 }
   0x6   : > { %s4006_s20 = smov (%p25_p0, %s24_s20), 0  ;;  %s4008_s21 = smov (!%p25_p0, %s27_s21), %s2802_s18 }
   0x7   : > { %p212_p3 = pnand %p2519_p1, %p211_p2  ;;  %p29_p4 = scmp.ge.s32.totalorder %s4008_s21, 2 }
   0x9   : > { %s4010_s21 = smov (%p29_p4, %s4008_s21), 0  ;;  %215 = sbr.rel (%p212_p3) target bundleno = 628 (0x274), region = 32 }
   0xe   : > { %v378_v0 = vld [vmem:[%s3996_s2 + $0x78] sm:$0xff]  ;;  %v377_v1 = vld [vmem:[%s3996_s2 + $0x70] sm:$0xff]  ;;  %v376_v2 = vld [vmem:[%s3996_s2 + $0x68] sm:$0xff]  ;;  %s2883_s6 = sshll.u32 %s2790_s15, 3  ;;  %p267_p5 = scmp.lt.s32.totalorder %s2794_s16, 1 }
   0xf   : > { %379 = vmatpush.msra.mxu0 %v378_v0  ;;  %2662 = vmatpush.msra.mxu1 %v378_v0  ;;  %v375_v3 = vld [vmem:[%s3996_s2 + $0x60] sm:$0xff]  ;;  %v374_v4 = vld [vmem:[%s3996_s2 + $0x58] sm:$0xff]  ;;  %v373_v5 = vld [vmem:[%s3996_s2 + $0x50] sm:$0xff]  ;;  %p269_p6 = scmp.lt.s32.totalorder %s2883_s6, 23  ;;  %p293_p8 = scmp.lt.s32.totalorder %s2883_s6, 15 }
  0x10   : > { %2663 = vmatpush.msra.mxu2 %v378_v0  ;;  %2664 = vmatpush.msra.mxu3 %v378_v0  ;;  %v372_v6 = vld [vmem:[%s3996_s2 + $0x48] sm:$0xff]  ;;  %v371_v7 = vld [vmem:[%s3996_s2 + $0x40] sm:$0xff]  ;;  %s4012_s16 = smov (!%p267_p5, %s2794_s16), 1  ;;  %v370_v8 = vld [vmem:[%s3996_s2 + $0x38] sm:$0xff]  ;;  %p303_p9 = scmp.lt.s32.totalorder %s2790_s15, 1 }
  0x11   : > { %380 = vmatpush.msra.mxu0 %v377_v1  ;;  %2665 = vmatpush.msra.mxu1 %v377_v1  ;;  %s270_s13 = scalar_select %p269_p6, %s2883_s6, 23  ;;  %v369_v9 = vld [vmem:[%s3996_s2 + $0x30] sm:$0xff]  ;;  %v368_v10 = vld [vmem:[%s3996_s2 + $0x28] sm:$0xff]  ;;  %v367_v11 = vld [vmem:[%s3996_s2 + $0x20] sm:$0xff] }
  0x12   : > { %2666 = vmatpush.msra.mxu2 %v377_v1  ;;  %2667 = vmatpush.msra.mxu3 %v377_v1  ;;  %s2711_s25 = smul.u32 72, %s4012_s16  ;;  %v366_v12 = vld [vmem:[%s3996_s2 + $0x18] sm:$0xff]  ;;  %v365_v13 = vld [vmem:[%s3996_s2 + $0x10] sm:$0xff]  ;;  %v364_v14 = vld [vmem:[%s3996_s2 + $0x8] sm:$0xff]  ;;  %s2526_s9 = sshll.u32 %s4012_s16, 5 }
  0x13   : > { %381 = vmatpush.msra.mxu0 %v376_v2  ;;  %2668 = vmatpush.msra.mxu1 %v376_v2  ;;  %s2710_s26 = smul.u32 3, %s270_s13  ;;  %v363_v15 = vld [vmem:[%s3996_s2] sm:$0xff]  ;;  %v2577_v20 = vld [vmem:[%s3996_s2 + $0x1f8] sm:$0xff]  ;;  %v2576_v24 = vld [vmem:[%s3996_s2 + $0x1f0] sm:$0xff]  ;;  %s4018_s15 = smov (!%p303_p9, %s2790_s15), 1 }
  0x14   : > { %2669 = vmatpush.msra.mxu2 %v376_v2  ;;  %2670 = vmatpush.msra.mxu3 %v376_v2  ;;  %v2545_v21 = vld [vmem:[%s3996_s2 + $0xf8] sm:$0xff]  ;;  %v2544_v25 = vld [vmem:[%s3996_s2 + $0xf0] sm:$0xff]  ;;  %v2575_v28 = vld [vmem:[%s3996_s2 + $0x1e8] sm:$0xff] }
  0x15   : > { %382 = vmatpush.msra.mxu0 %v375_v3  ;;  %2671 = vmatpush.msra.mxu1 %v375_v3  ;;  %s273_s5 = sadd.s32 %s2711_s25, %s2710_s26  ;;  %v2593_v22 = vld [vmem:[%s3996_s2 + $0x278] sm:$0xff]  ;;  %v2592_v26 = vld [vmem:[%s3996_s2 + $0x270] sm:$0xff]  ;;  %v2543_v29 = vld [vmem:[%s3996_s2 + $0xe8] sm:$0xff] }
  0x16   : > { %2672 = vmatpush.msra.mxu2 %v375_v3  ;;  %2673 = vmatpush.msra.mxu3 %v375_v3  ;;  %s2521_s11 = sshll.u32 %s273_s5, 3  ;;  %v2561_v23 = vld [vmem:[%s3996_s2 + $0x178] sm:$0xff]  ;;  %v2560_v27 = vld [vmem:[%s3996_s2 + $0x170] sm:$0xff]  ;;  %v2591_v30 = vld [vmem:[%s3996_s2 + $0x268] sm:$0xff]  ;;  %s2661_s5 = sadd.s32 8, %s2883_s6 }
  0x17   : > { %383 = vmatpush.msra.mxu0 %v374_v4  ;;  %2674 = vmatpush.msra.mxu1 %v374_v4  ;;  %s2927_s23 = scalar_lea.vmem %s3994_s0, %s2521_s11  ;;  %v2559_v31 = vld [vmem:[%s3996_s2 + $0x168] sm:$0xff]  ;;  %v2574_v36 = vld [vmem:[%s3996_s2 + $0x1e0] sm:$0xff]  ;;  %v2573_v40 = vld [vmem:[%s3996_s2 + $0x1d8] sm:$0xff]  ;;  %p281_p7 = scmp.lt.s32.totalorder %s2661_s5, 23 }
  0x18   : > { %2675 = vmatpush.msra.mxu2 %v374_v4  ;;  %2676 = vmatpush.msra.mxu3 %v374_v4  ;;  %v2933_v16 = vld [vmem:[%s2927_s23] sm:$0xff]  ;;  %v2936_v17 = vld [vmem:[%s2927_s23 + $0x30] sm:$0xff]  ;;  %v2985_v32 = vld [vmem:[%s2927_s23 + $0x8] sm:$0xff]  ;;  %s4016_s6 = smov (!%p293_p8, %s2883_s6), 15 }
  0x19   : > { %384 = vmatpush.msra.mxu0 %v373_v5  ;;  %2677 = vmatpush.msra.mxu1 %v373_v5  ;;  %v2939_v18 = vld [vmem:[%s2927_s23 + $0x60] sm:$0xff]  ;;  %v2942_v19 = vld [vmem:[%s2927_s23 + $0x90] sm:$0xff]  ;;  %v2988_v33 = vld [vmem:[%s2927_s23 + $0x38] sm:$0xff]  ;;  %s4014_s5 = smov (!%p281_p7, %s2661_s5), 23  ;;  %s2525_s8 = sshll.u32 %s4016_s6, 1 }
  0x1a   : > { %2678 = vmatpush.msra.mxu2 %v373_v5  ;;  %2679 = vmatpush.msra.mxu3 %v373_v5  ;;  %v2991_v34 = vld [vmem:[%s2927_s23 + $0x68] sm:$0xff]  ;;  %v2994_v35 = vld [vmem:[%s2927_s23 + $0x98] sm:$0xff]  ;;  %v2542_v37 = vld [vmem:[%s3996_s2 + $0xe0] sm:$0xff]  ;;  %s2712_s13 = smul.u32 3, %s4014_s5  ;;  %s297_s10 = sadd.s32 %s2526_s9, %s2525_s8 }
  0x1b   : > { %385 = vmatpush.msra.mxu0 %v372_v6  ;;  %2680 = vmatpush.msra.mxu1 %v372_v6  ;;  %v2590_v38 = vld [vmem:[%s3996_s2 + $0x260] sm:$0xff]  ;;  %v2541_v41 = vld [vmem:[%s3996_s2 + $0xd8] sm:$0xff]  ;;  %v2572_v44 = vld [vmem:[%s3996_s2 + $0x1d0] sm:$0xff] }
  0x1c   : > { %2681 = vmatpush.msra.mxu2 %v372_v6  ;;  %2682 = vmatpush.msra.mxu3 %v372_v6  ;;  %v2558_v39 = vld [vmem:[%s3996_s2 + $0x160] sm:$0xff]  ;;  %v2589_v42 = vld [vmem:[%s3996_s2 + $0x258] sm:$0xff]  ;;  %v2540_v45 = vld [vmem:[%s3996_s2 + $0xd0] sm:$0xff]  ;;  %s285_s24 = sadd.s32 %s2712_s13, %s2711_s25  ;;  %s2528_s13 = sshll.u32 %s4012_s16, 1 }
  0x1d   : > { %386 = vmatpush.msra.mxu0 %v371_v7  ;;  %2683 = vmatpush.msra.mxu1 %v371_v7  ;;  %v2557_v43 = vld [vmem:[%s3996_s2 + $0x158] sm:$0xff]  ;;  %v2588_v46 = vld [vmem:[%s3996_s2 + $0x250] sm:$0xff]  ;;  %v3040_v49 = vld [vmem:[%s2927_s23 + $0x40] sm:$0xff]  ;;  %s2523_s26 = sshll.u32 %s285_s24, 3  ;;  %s306_s14 = sadd.s32 %s2528_s13, %s4018_s15 }
  0x1e   : > { %2684 = vmatpush.msra.mxu2 %v371_v7  ;;  %2685 = vmatpush.msra.mxu3 %v371_v7  ;;  %v2556_v47 = vld [vmem:[%s3996_s2 + $0x150] sm:$0xff]  ;;  %v3046_v51 = vld [vmem:[%s2927_s23 + $0xa0] sm:$0xff]  ;;  %v2571_v52 = vld [vmem:[%s3996_s2 + $0x1c8] sm:$0xff]  ;;  %s3562_s7 = scalar_lea.vmem %s3995_s1, %s2523_s26  ;;  %s2529_s22 = sshll.u32 %s306_s14, 1 }
  0x1f   : > { %387 = vmatpush.msra.mxu0 %v370_v8  ;;  %2686 = vmatpush.msra.mxu1 %v370_v8  ;;  %v3037_v48 = vld [vmem:[%s2927_s23 + $0x10] sm:$0xff]  ;;  %v2539_v53 = vld [vmem:[%s3996_s2 + $0xc8] sm:$0xff]  ;;  %v2570_v56 = vld [vmem:[%s3996_s2 + $0x1c0] sm:$0xff]  ;;  %s308_s27 = scalar_lea.vmem %s3998_s4, %s2529_s22 }
  0x20   : > { %2687 = vmatpush.msra.mxu2 %v370_v8  ;;  %2688 = vmatpush.msra.mxu3 %v370_v8  ;;  %v3043_v50 = vld [vmem:[%s2927_s23 + $0x70] sm:$0xff]  ;;  %v2587_v54 = vld [vmem:[%s3996_s2 + $0x248] sm:$0xff]  ;;  %v2538_v57 = vld [vmem:[%s3996_s2 + $0xc0] sm:$0xff] }
  0x21   : > { %388 = vmatpush.msra.mxu0 %v369_v9  ;;  %2689 = vmatpush.msra.mxu1 %v369_v9  ;;  %v2555_v55 = vld [vmem:[%s3996_s2 + $0x148] sm:$0xff]  ;;  %v2586_v58 = vld [vmem:[%s3996_s2 + $0x240] sm:$0xff]  ;;  %v2569_v60 = vld [vmem:[%s3996_s2 + $0x1b8] sm:$0xff] }
  0x22   : > { %2690 = vmatpush.msra.mxu2 %v369_v9  ;;  %2691 = vmatpush.msra.mxu3 %v369_v9  ;;  %v2554_v59 = vld [vmem:[%s3996_s2 + $0x140] sm:$0xff]  ;;  %v2537_v61 = vld [vmem:[%s3996_s2 + $0xb8] sm:$0xff]  ;;  %v3092_v1 = vld [vmem:[%s2927_s23 + $0x48] sm:$0xff] }
  0x23   : > { %389 = vmatpush.msra.mxu0 %v368_v10  ;;  %2692 = vmatpush.msra.mxu1 %v368_v10  ;;  %v2585_v62 = vld [vmem:[%s3996_s2 + $0x238] sm:$0xff]  ;;  %v3098_v3 = vld [vmem:[%s2927_s23 + $0xa8] sm:$0xff]  ;;  %v2568_v4 = vld [vmem:[%s3996_s2 + $0x1b0] sm:$0xff] }
  0x24   : > { %2693 = vmatpush.msra.mxu2 %v368_v10  ;;  %2694 = vmatpush.msra.mxu3 %v368_v10  ;;  %v2553_v63 = vld [vmem:[%s3996_s2 + $0x138] sm:$0xff]  ;;  %v2536_v5 = vld [vmem:[%s3996_s2 + $0xb0] sm:$0xff]  ;;  %v2567_v8 = vld [vmem:[%s3996_s2 + $0x1a8] sm:$0xff] }
  0x25   : > { %390 = vmatpush.msra.mxu0 %v367_v11  ;;  %2695 = vmatpush.msra.mxu1 %v367_v11  ;;  %v3089_v0 = vld [vmem:[%s2927_s23 + $0x18] sm:$0xff]  ;;  %v2552_v6 = vld [vmem:[%s3996_s2 + $0x130] sm:$0xff]  ;;  %v2535_v9 = vld [vmem:[%s3996_s2 + $0xa8] sm:$0xff] }
  0x26   : > { %2696 = vmatpush.msra.mxu2 %v367_v11  ;;  %2697 = vmatpush.msra.mxu3 %v367_v11  ;;  %v3095_v2 = vld [vmem:[%s2927_s23 + $0x78] sm:$0xff]  ;;  %v2584_v7 = vld [vmem:[%s3996_s2 + $0x230] sm:$0xff]  ;;  %v2551_v10 = vld [vmem:[%s3996_s2 + $0x128] sm:$0xff] }
  0x27   : > { %391 = vmatpush.msra.mxu0 %v366_v12  ;;  %2698 = vmatpush.msra.mxu1 %v366_v12  ;;  %v2583_v11 = vld [vmem:[%s3996_s2 + $0x228] sm:$0xff] }
  0x28   : > { %2699 = vmatpush.msra.mxu2 %v366_v12  ;;  %2700 = vmatpush.msra.mxu3 %v366_v12  ;;  %v2566_v12 = vld [vmem:[%s3996_s2 + $0x1a0] sm:$0xff] }
  0x29   : > { %392 = vmatpush.msra.mxu0 %v365_v13  ;;  %2701 = vmatpush.msra.mxu1 %v365_v13 }
  0x2a   : > { %2702 = vmatpush.msra.mxu2 %v365_v13  ;;  %2703 = vmatpush.msra.mxu3 %v365_v13  ;;  %v2534_v13 = vld [vmem:[%s3996_s2 + $0xa0] sm:$0xff] }
  0x2b   : > { %393 = vmatpush.msra.mxu0 %v364_v14  ;;  %2704 = vmatpush.msra.mxu1 %v364_v14 }
  0x2c   : > { %2705 = vmatpush.msra.mxu2 %v364_v14  ;;  %2706 = vmatpush.msra.mxu3 %v364_v14  ;;  %v2550_v14 = vld [vmem:[%s3996_s2 + $0x120] sm:$0xff] }
  0x2d   : > { %394 = vmatpush.msra.mxu0 %v363_v15  ;;  %2707 = vmatpush.msra.mxu1 %v363_v15 }
  0x2e   : > { %2708 = vmatpush.msra.mxu2 %v363_v15  ;;  %2709 = vmatpush.msra.mxu3 %v363_v15  ;;  %v2582_v15 = vld [vmem:[%s3996_s2 + $0x220] sm:$0xff] }
  0x2f   : > { %395 = vmatmul.f32.vlgmr.msra.gmra.mxu0 %v2933_v16  ;;  %413 = vmatmul.f32.vlgmr.msra.gmra.mxu1 %v2936_v17 }
  0x30   : > { %431 = vmatmul.f32.vlgmr.msra.gmra.mxu2 %v2939_v18  ;;  %449 = vmatmul.f32.vlgmr.msra.gmra.mxu3 %v2942_v19 }
  0x31   : > { %1013 = vmatpush.msrb.mxu3 %v2577_v20  ;;  %557 = vmatpush.msrb.mxu1 %v2545_v21  ;;  %v3141_v20 = vld [vmem:[%s2927_s23 + $0x20] sm:$0xff]  ;;  %v3144_v21 = vld [vmem:[%s2927_s23 + $0x50] sm:$0xff] }
  0x32   : > { %1191 = vmatpush.msrb.mxu0 %v2593_v22  ;;  %786 = vmatpush.msrb.mxu2 %v2561_v23  ;;  %v3147_v22 = vld [vmem:[%s2927_s23 + $0x80] sm:$0xff]  ;;  %v3150_v23 = vld [vmem:[%s2927_s23 + $0xb0] sm:$0xff] }
  0x33   : > { %1014 = vmatpush.msrb.mxu3 %v2576_v24  ;;  %558 = vmatpush.msrb.mxu1 %v2544_v25  ;;  %v2565_v24 = vld [vmem:[%s3996_s2 + $0x198] sm:$0xff] }
  0x34   : > { %1192 = vmatpush.msrb.mxu0 %v2592_v26  ;;  %787 = vmatpush.msrb.mxu2 %v2560_v27  ;;  %v2533_v25 = vld [vmem:[%s3996_s2 + $0x98] sm:$0xff] }
  0x35   : > { %1015 = vmatpush.msrb.mxu3 %v2575_v28  ;;  %559 = vmatpush.msrb.mxu1 %v2543_v29  ;;  %v2549_v26 = vld [vmem:[%s3996_s2 + $0x118] sm:$0xff]  ;;  %v2564_v28 = vld [vmem:[%s3996_s2 + $0x190] sm:$0xff] }
  0x36   : > { %1193 = vmatpush.msrb.mxu0 %v2591_v30  ;;  %788 = vmatpush.msrb.mxu2 %v2559_v31  ;;  %v2581_v27 = vld [vmem:[%s3996_s2 + $0x218] sm:$0xff]  ;;  %v2532_v29 = vld [vmem:[%s3996_s2 + $0x90] sm:$0xff] }
  0x37   : > { %398 = vmatmul.f32.gmra.mxu0 %v2985_v32  ;;  %416 = vmatmul.f32.gmra.mxu1 %v2988_v33  ;;  %v2548_v30 = vld [vmem:[%s3996_s2 + $0x110] sm:$0xff] }
  0x38   : > { %434 = vmatmul.f32.gmra.mxu2 %v2991_v34  ;;  %452 = vmatmul.f32.gmra.mxu3 %v2994_v35  ;;  %v2580_v31 = vld [vmem:[%s3996_s2 + $0x210] sm:$0xff] }
  0x39   : > { %1016 = vmatpush.msrb.mxu3 %v2574_v36  ;;  %560 = vmatpush.msrb.mxu1 %v2542_v37  ;;  %v2563_v36 = vld [vmem:[%s3996_s2 + $0x188] sm:$0xff] }
  0x3a   : > { %1194 = vmatpush.msrb.mxu0 %v2590_v38  ;;  %789 = vmatpush.msrb.mxu2 %v2558_v39  ;;  %v2531_v37 = vld [vmem:[%s3996_s2 + $0x88] sm:$0xff] }
  0x3b   : > { %1017 = vmatpush.msrb.mxu3 %v2573_v40  ;;  %561 = vmatpush.msrb.mxu1 %v2541_v41  ;;  %v2547_v38 = vld [vmem:[%s3996_s2 + $0x108] sm:$0xff]  ;;  %v3196_v41 = vld [vmem:[%s2927_s23 + $0x58] sm:$0xff] }
  0x3c   : > { %1195 = vmatpush.msrb.mxu0 %v2589_v42  ;;  %790 = vmatpush.msrb.mxu2 %v2557_v43  ;;  %v2579_v39 = vld [vmem:[%s3996_s2 + $0x208] sm:$0xff]  ;;  %v3202_v43 = vld [vmem:[%s2927_s23 + $0xb8] sm:$0xff] }
  0x3d   : > { %1018 = vmatpush.msrb.mxu3 %v2572_v44  ;;  %562 = vmatpush.msrb.mxu1 %v2540_v45  ;;  %v3193_v40 = vld [vmem:[%s2927_s23 + $0x28] sm:$0xff]  ;;  %v2562_v44 = vld [vmem:[%s3996_s2 + $0x180] sm:$0xff] }
  0x3e   : > { %1196 = vmatpush.msrb.mxu0 %v2588_v46  ;;  %791 = vmatpush.msrb.mxu2 %v2556_v47  ;;  %v3199_v42 = vld [vmem:[%s2927_s23 + $0x88] sm:$0xff]  ;;  %v2530_v45 = vld [vmem:[%s3996_s2 + $0x80] sm:$0xff] }
  0x3f   : > { %401 = vmatmul.f32.gmra.mxu0 %v3037_v48  ;;  %419 = vmatmul.f32.gmra.mxu1 %v3040_v49  ;;  %v2546_v46 = vld [vmem:[%s3996_s2 + $0x100] sm:$0xff] }
  0x40   : > { %437 = vmatmul.f32.gmra.mxu2 %v3043_v50  ;;  %455 = vmatmul.f32.gmra.mxu3 %v3046_v51  ;;  %v2578_v47 = vld [vmem:[%s3996_s2 + $0x200] sm:$0xff] }
  0x41   : > { %1019 = vmatpush.msrb.mxu3 %v2571_v52  ;;  %563 = vmatpush.msrb.mxu1 %v2539_v53  ;;  %v2641_v52 = vld [vmem:[%s3996_s2 + $0x3f8] sm:$0xff] }
  0x42   : > { %1197 = vmatpush.msrb.mxu0 %v2587_v54  ;;  %792 = vmatpush.msrb.mxu2 %v2555_v55  ;;  %v2609_v53 = vld [vmem:[%s3996_s2 + $0x2f8] sm:$0xff] }
  0x43   : > { %1020 = vmatpush.msrb.mxu3 %v2570_v56  ;;  %564 = vmatpush.msrb.mxu1 %v2538_v57  ;;  %v2657_v54 = vld [vmem:[%s3996_s2 + $0x478] sm:$0xff]  ;;  %v2640_v56 = vld [vmem:[%s3996_s2 + $0x3f0] sm:$0xff] }
  0x44   : > { %1198 = vmatpush.msrb.mxu0 %v2586_v58  ;;  %793 = vmatpush.msrb.mxu2 %v2554_v59  ;;  %v2625_v55 = vld [vmem:[%s3996_s2 + $0x378] sm:$0xff]  ;;  %v2608_v57 = vld [vmem:[%s3996_s2 + $0x2f0] sm:$0xff] }
  0x45   : > { %1021 = vmatpush.msrb.mxu3 %v2569_v60  ;;  %565 = vmatpush.msrb.mxu1 %v2537_v61  ;;  %v2656_v58 = vld [vmem:[%s3996_s2 + $0x470] sm:$0xff]  ;;  %v2639_v60 = vld [vmem:[%s3996_s2 + $0x3e8] sm:$0xff] }
  0x46   : > { %1199 = vmatpush.msrb.mxu0 %v2585_v62  ;;  %794 = vmatpush.msrb.mxu2 %v2553_v63  ;;  %v2624_v59 = vld [vmem:[%s3996_s2 + $0x370] sm:$0xff]  ;;  %v2607_v61 = vld [vmem:[%s3996_s2 + $0x2e8] sm:$0xff] }
  0x47   : > { %404 = vmatmul.f32.gmra.mxu0 %v3089_v0  ;;  %422 = vmatmul.f32.gmra.mxu1 %v3092_v1  ;;  %v2655_v62 = vld [vmem:[%s3996_s2 + $0x468] sm:$0xff] }
  0x48   : > { %440 = vmatmul.f32.gmra.mxu2 %v3095_v2  ;;  %458 = vmatmul.f32.gmra.mxu3 %v3098_v3  ;;  %v2623_v63 = vld [vmem:[%s3996_s2 + $0x368] sm:$0xff] }
  0x49   : > { %1022 = vmatpush.msrb.mxu3 %v2568_v4  ;;  %566 = vmatpush.msrb.mxu1 %v2536_v5  ;;  %v2638_v4 = vld [vmem:[%s3996_s2 + $0x3e0] sm:$0xff] }
  0x4a   : > { %795 = vmatpush.msrb.mxu2 %v2552_v6  ;;  %1200 = vmatpush.msrb.mxu0 %v2584_v7  ;;  %v2654_v5 = vld [vmem:[%s3996_s2 + $0x460] sm:$0xff]  ;;  %v2605_v7 = vld [vmem:[%s3996_s2 + $0x2d8] sm:$0xff] }
  0x4b   : > { %1023 = vmatpush.msrb.mxu3 %v2567_v8  ;;  %567 = vmatpush.msrb.mxu1 %v2535_v9  ;;  %v2622_v6 = vld [vmem:[%s3996_s2 + $0x360] sm:$0xff]  ;;  %v2621_v8 = vld [vmem:[%s3996_s2 + $0x358] sm:$0xff]  ;;  %v2636_v9 = vld [vmem:[%s3996_s2 + $0x3d0] sm:$0xff] }
  0x4c   : > { %796 = vmatpush.msrb.mxu2 %v2551_v10  ;;  %1201 = vmatpush.msrb.mxu0 %v2583_v11  ;;  %v2604_v10 = vld [vmem:[%s3996_s2 + $0x2d0] sm:$0xff] }
  0x4d   : > { %1024 = vmatpush.msrb.mxu3 %v2566_v12  ;;  %568 = vmatpush.msrb.mxu1 %v2534_v13  ;;  %v2652_v11 = vld [vmem:[%s3996_s2 + $0x450] sm:$0xff]  ;;  %v2635_v13 = vld [vmem:[%s3996_s2 + $0x3c8] sm:$0xff] }
  0x4e   : > { %797 = vmatpush.msrb.mxu2 %v2550_v14  ;;  %1202 = vmatpush.msrb.mxu0 %v2582_v15  ;;  %v2620_v12 = vld [vmem:[%s3996_s2 + $0x350] sm:$0xff]  ;;  %v2603_v14 = vld [vmem:[%s3996_s2 + $0x2c8] sm:$0xff] }
  0x4f   : > { %407 = vmatmul.f32.gmra.mxu0 %v3141_v20  ;;  %425 = vmatmul.f32.gmra.mxu1 %v3144_v21  ;;  %v2651_v15 = vld [vmem:[%s3996_s2 + $0x448] sm:$0xff] }
  0x50   : > { %443 = vmatmul.f32.gmra.mxu2 %v3147_v22  ;;  %461 = vmatmul.f32.gmra.mxu3 %v3150_v23 }
  0x51   : > { %1025 = vmatpush.msrb.mxu3 %v2565_v24  ;;  %569 = vmatpush.msrb.mxu1 %v2533_v25  ;;  %v2619_v24 = vld [vmem:[%s3996_s2 + $0x348] sm:$0xff]  ;;  %v2634_v25 = vld [vmem:[%s3996_s2 + $0x3c0] sm:$0xff] }
  0x52   : > { %798 = vmatpush.msrb.mxu2 %v2549_v26  ;;  %1203 = vmatpush.msrb.mxu0 %v2581_v27  ;;  %v2650_v26 = vld [vmem:[%s3996_s2 + $0x440] sm:$0xff] }
  0x53   : > { %1026 = vmatpush.msrb.mxu3 %v2564_v28  ;;  %570 = vmatpush.msrb.mxu1 %v2532_v29  ;;  %v2618_v27 = vld [vmem:[%s3996_s2 + $0x340] sm:$0xff]  ;;  %v2633_v28 = vld [vmem:[%s3996_s2 + $0x3b8] sm:$0xff] }
  0x54   : > { %799 = vmatpush.msrb.mxu2 %v2548_v30  ;;  %1204 = vmatpush.msrb.mxu0 %v2580_v31  ;;  %v2601_v29 = vld [vmem:[%s3996_s2 + $0x2b8] sm:$0xff] }
  0x55   : > { %1027 = vmatpush.msrb.mxu3 %v2563_v36  ;;  %571 = vmatpush.msrb.mxu1 %v2531_v37  ;;  %v2649_v30 = vld [vmem:[%s3996_s2 + $0x438] sm:$0xff]  ;;  %v2632_v36 = vld [vmem:[%s3996_s2 + $0x3b0] sm:$0xff] }
  0x56   : > { %800 = vmatpush.msrb.mxu2 %v2547_v38  ;;  %1205 = vmatpush.msrb.mxu0 %v2579_v39  ;;  %v2617_v31 = vld [vmem:[%s3996_s2 + $0x338] sm:$0xff]  ;;  %v2600_v39 = vld [vmem:[%s3996_s2 + $0x2b0] sm:$0xff] }
  0x57   : > { %410 = vmatmul.f32.gmra.mxu0 %v3193_v40  ;;  %428 = vmatmul.f32.gmra.mxu1 %v3196_v41 }
  0x58   : > { %446 = vmatmul.f32.gmra.mxu2 %v3199_v42  ;;  %464 = vmatmul.f32.gmra.mxu3 %v3202_v43 }
  0x59   : > { %1028 = vmatpush.msrb.mxu3 %v2562_v44  ;;  %572 = vmatpush.msrb.mxu1 %v2530_v45 }
  0x5a   : > { %801 = vmatpush.msrb.mxu2 %v2546_v46  ;;  %1206 = vmatpush.msrb.mxu0 %v2578_v47  ;;  %v2648_v46 = vld [vmem:[%s3996_s2 + $0x430] sm:$0xff] }
  0x5b   : > { %1821 = vmatpush.msra.mxu3 %v2641_v52  ;;  %1417 = vmatpush.msra.mxu1 %v2609_v53  ;;  %v2616_v53 = vld [vmem:[%s3996_s2 + $0x330] sm:$0xff] }
  0x5c   : > { %2047 = vmatpush.msra.mxu0 %v2657_v54  ;;  %1643 = vmatpush.msra.mxu2 %v2625_v55  ;;  %v2631_v54 = vld [vmem:[%s3996_s2 + $0x3a8] sm:$0xff] }
  0x5d   : > { %1822 = vmatpush.msra.mxu3 %v2640_v56  ;;  %1418 = vmatpush.msra.mxu1 %v2608_v57  ;;  %v2599_v55 = vld [vmem:[%s3996_s2 + $0x2a8] sm:$0xff] }
  0x5e   : > { %2048 = vmatpush.msra.mxu0 %v2656_v58  ;;  %1644 = vmatpush.msra.mxu2 %v2624_v59 }
  0x5f   : > { %573 = vmatmul.f32.vlgmr.msrb.gmra.mxu1 %v2933_v16  ;;  %1207 = vmatmul.f32.vlgmr.msrb.gmra.mxu0 %v3089_v0 }
  0x60   : > { %802 = vmatmul.f32.vlgmr.msrb.gmra.mxu2 %v2933_v16  ;;  %1029 = vmatmul.f32.vlgmr.msrb.gmra.mxu3 %v3089_v0  ;;  %v2606_v16 = vld [vmem:[%s3996_s2 + $0x2e0] sm:$0xff] }
  0x61   : > { %1823 = vmatpush.msra.mxu3 %v2639_v60  ;;  %1419 = vmatpush.msra.mxu1 %v2607_v61  ;;  %v2647_v60 = vld [vmem:[%s3996_s2 + $0x428] sm:$0xff] }
  0x62   : > { %2049 = vmatpush.msra.mxu0 %v2655_v62  ;;  %1645 = vmatpush.msra.mxu2 %v2623_v63  ;;  %v2615_v61 = vld [vmem:[%s3996_s2 + $0x328] sm:$0xff] }
  0x63   : > { %1824 = vmatpush.msra.mxu3 %v2638_v4  ;;  %1420 = vmatpush.msra.mxu1 %v2606_v16 }
  0x64   : > { %2050 = vmatpush.msra.mxu0 %v2654_v5  ;;  %1646 = vmatpush.msra.mxu2 %v2622_v6  ;;  %v2598_v5 = vld [vmem:[%s3996_s2 + $0x2a0] sm:$0xff] }
  0x65   : > { %1421 = vmatpush.msra.mxu1 %v2605_v7 }
  0x66   : > { %1647 = vmatpush.msra.mxu2 %v2621_v8  ;;  %v2614_v8 = vld [vmem:[%s3996_s2 + $0x320] sm:$0xff] }
  0x67   : > { %576 = vmatmul.f32.gmra.mxu1 %v2985_v32  ;;  %1210 = vmatmul.f32.gmra.mxu0 %v3141_v20 }
  0x68   : > { %805 = vmatmul.f32.gmra.mxu2 %v2985_v32  ;;  %1032 = vmatmul.f32.gmra.mxu3 %v3141_v20  ;;  %v2637_v32 = vld [vmem:[%s3996_s2 + $0x3d8] sm:$0xff] }
  0x69   : > { %1825 = vmatpush.msra.mxu3 %v2637_v32  ;;  %1422 = vmatpush.msra.mxu1 %v2604_v10  ;;  %v2597_v10 = vld [vmem:[%s3996_s2 + $0x298] sm:$0xff] }
  0x6a   : > { %1648 = vmatpush.msra.mxu2 %v2620_v12 }
  0x6b   : > { %1826 = vmatpush.msra.mxu3 %v2636_v9  ;;  %1423 = vmatpush.msra.mxu1 %v2603_v14  ;;  %v2629_v9 = vld [vmem:[%s3996_s2 + $0x398] sm:$0xff] }
  0x6c   : > { %1649 = vmatpush.msra.mxu2 %v2619_v24  ;;  %v2645_v14 = vld [vmem:[%s3996_s2 + $0x418] sm:$0xff] }
  0x6d   : > { %1827 = vmatpush.msra.mxu3 %v2635_v13 }
  0x6e   : > { %1650 = vmatpush.msra.mxu2 %v2618_v27  ;;  %v670_v27 = vlaneseq }
  0x6f   : > { %579 = vmatmul.f32.gmra.mxu1 %v3037_v48  ;;  %1213 = vmatmul.f32.gmra.mxu0 %v3193_v40 }
  0x70   : > { %808 = vmatmul.f32.gmra.mxu2 %v3037_v48  ;;  %1035 = vmatmul.f32.gmra.mxu3 %v3193_v40  ;;  %v2653_v48 = vld [vmem:[%s3996_s2 + $0x458] sm:$0xff] }
  0x71   : > { %2051 = vmatpush.msra.mxu0 %v2653_v48  ;;  %1828 = vmatpush.msra.mxu3 %v2634_v25 }
  0x72   : > { %1651 = vmatpush.msra.mxu2 %v2617_v31  ;;  %v3484_v31 = vshrl.u32 %v670_v27, 7 }
  0x73   : > { %2052 = vmatpush.msra.mxu0 %v2652_v11  ;;  %1829 = vmatpush.msra.mxu3 %v2633_v28  ;;  %v2596_v28 = vld [vmem:[%s3996_s2 + $0x290] sm:$0xff] }
  0x74   : > { %1652 = vmatpush.msra.mxu2 %v2616_v53  ;;  %vm672_vm0 = vcmp.lt.s32.totalorder %v3484_v31, 7  ;;  %vm899_vm1 = vcmp.lt.s32.totalorder %v3484_v31, 6 }
  0x75   : > { %2053 = vmatpush.msra.mxu0 %v2651_v15  ;;  %1830 = vmatpush.msra.mxu3 %v2632_v36  ;;  %v2613_v15 = vld [vmem:[%s3996_s2 + $0x318] sm:$0xff] }
  0x76   : > { %1653 = vmatpush.msra.mxu2 %v2615_v61 }
  0x77   : > { %582 = vmatmul.f32.gmra.mxu1 %v3089_v0  ;;  %1216 = vmatmul.f32.gmra.mxu0 %v2936_v17 }
  0x78   : > { %811 = vmatmul.f32.gmra.mxu2 %v3089_v0  ;;  %1038 = vmatmul.f32.gmra.mxu3 %v2936_v17 }
  0x79   : > { %2054 = vmatpush.msra.mxu0 %v2650_v26  ;;  %1831 = vmatpush.msra.mxu3 %v2631_v54  ;;  %v2612_v54 = vld [vmem:[%s3996_s2 + $0x310] sm:$0xff] }
  0x7a   : > { %1654 = vmatpush.msra.mxu2 %v2614_v8 }
  0x7b   : > { %2055 = vmatpush.msra.mxu0 %v2649_v30 }
  0x7c   : > { %1655 = vmatpush.msra.mxu2 %v2613_v15 }
  0x7d   : > { %2056 = vmatpush.msra.mxu0 %v2648_v46 }
  0x7e   : > { %1656 = vmatpush.msra.mxu2 %v2612_v54 }
  0x7f   : > { %585 = vmatmul.f32.gmra.mxu1 %v3141_v20  ;;  %1219 = vmatmul.f32.gmra.mxu0 %v2988_v33 }
  0x80   : > { %814 = vmatmul.f32.gmra.mxu2 %v3141_v20  ;;  %1041 = vmatmul.f32.gmra.mxu3 %v2988_v33 }
  0x81   : > { %2057 = vmatpush.msra.mxu0 %v2647_v60 }
  0x87   : > { %588 = vmatmul.f32.gmra.mxu1 %v3193_v40  ;;  %1222 = vmatmul.f32.gmra.mxu0 %v3040_v49 }
  0x88   : > { %817 = vmatmul.f32.gmra.mxu2 %v3193_v40  ;;  %1044 = vmatmul.f32.gmra.mxu3 %v3040_v49 }
  0x8f   : > { %591 = vmatmul.f32.gmra.mxu1 %v2936_v17  ;;  %1225 = vmatmul.f32.gmra.mxu0 %v3092_v1 }
  0x90   : > { %820 = vmatmul.f32.gmra.mxu2 %v2936_v17  ;;  %1047 = vmatmul.f32.gmra.mxu3 %v3092_v1  ;;  %v2602_v17 = vld [vmem:[%s3996_s2 + $0x2c0] sm:$0xff] }
  0x91   : > { %1424 = vmatpush.msra.mxu1 %v2602_v17 }
  0x93   : > { %1425 = vmatpush.msra.mxu1 %v2601_v29 }
  0x95   : > { %1426 = vmatpush.msra.mxu1 %v2600_v39 }
  0x97   : > { %594 = vmatmul.f32.gmra.mxu1 %v2988_v33  ;;  %1228 = vmatmul.f32.gmra.mxu0 %v3144_v21 }
  0x98   : > { %823 = vmatmul.f32.gmra.mxu2 %v2988_v33  ;;  %1050 = vmatmul.f32.gmra.mxu3 %v3144_v21 }
  0x99   : > { %1427 = vmatpush.msra.mxu1 %v2599_v55  ;;  %v2627_v55 = vld [vmem:[%s3996_s2 + $0x388] sm:$0xff] }
  0x9b   : > { %1428 = vmatpush.msra.mxu1 %v2598_v5 }
  0x9d   : > { %1429 = vmatpush.msra.mxu1 %v2597_v10 }
  0x9f   : > { %597 = vmatmul.f32.gmra.mxu1 %v3040_v49  ;;  %1231 = vmatmul.f32.gmra.mxu0 %v3196_v41 }
  0xa0   : > { %826 = vmatmul.f32.gmra.mxu2 %v3040_v49  ;;  %1053 = vmatmul.f32.gmra.mxu3 %v3196_v41 }
  0xa1   : > { %1430 = vmatpush.msra.mxu1 %v2596_v28 }
  0xa7   : > { %600 = vmatmul.f32.gmra.mxu1 %v3092_v1  ;;  %1234 = vmatmul.f32.gmra.mxu0 %v2939_v18 }
  0xa8   : > { %829 = vmatmul.f32.gmra.mxu2 %v3092_v1  ;;  %1056 = vmatmul.f32.gmra.mxu3 %v2939_v18 }
  0xac   : > { %v3371_v37 = vpop.f32.mrf.mxu0  ;;  %v3373_v38 = vpop.f32.mrf.mxu1 }
  0xaf   : > { %603 = vmatmul.f32.gmra.mxu1 %v3144_v21  ;;  %1237 = vmatmul.f32.gmra.mxu0 %v2991_v34 }
  0xb0   : > { %832 = vmatmul.f32.gmra.mxu2 %v3144_v21  ;;  %1059 = vmatmul.f32.gmra.mxu3 %v2991_v34 }
  0xb3   : > { %v3382_v44 = vpop.f32.mrf.mxu2  ;;  %v3384_v45 = vpop.f32.mrf.mxu3 }
  0xb4   : > { %v3389_v47 = vpop.f32.mrf.mxu0  ;;  %v3391_v52 = vpop.f32.mrf.mxu1 }
  0xb7   : > { %606 = vmatmul.f32.gmra.mxu1 %v3196_v41  ;;  %1240 = vmatmul.f32.gmra.mxu0 %v3043_v50 }
  0xb8   : > { %835 = vmatmul.f32.gmra.mxu2 %v3196_v41  ;;  %1062 = vmatmul.f32.gmra.mxu3 %v3043_v50 }
  0xbb   : > { %v3406_v56 = vpop.f32.mrf.mxu2  ;;  %v3408_v57 = vpop.f32.mrf.mxu3 }
  0xbc   : > { %v402_v58 = vpop.f32.mrf.mxu0  ;;  %v420_v59 = vpop.f32.mrf.mxu1 }
  0xbd   : > { %v2595_v58 = vld [vmem:[%s3996_s2 + $0x288] sm:$0xff] }
  0xbe   : > { %1431 = vmatpush.msra.mxu1 %v2595_v58  ;;  %v2610_v58 = vld [vmem:[%s3996_s2 + $0x300] sm:$0xff] }
  0xbf   : > { %609 = vmatmul.f32.gmra.mxu1 %v2939_v18  ;;  %1243 = vmatmul.f32.gmra.mxu0 %v3095_v2 }
  0xc0   : > { %838 = vmatmul.f32.gmra.mxu2 %v2939_v18  ;;  %1065 = vmatmul.f32.gmra.mxu3 %v3095_v2  ;;  %v2630_v18 = vld [vmem:[%s3996_s2 + $0x3a0] sm:$0xff] }
  0xc1   : > { %1832 = vmatpush.msra.mxu3 %v2630_v18 }
  0xc3   : > { %v438_v62 = vpop.f32.mrf.mxu2  ;;  %v456_v63 = vpop.f32.mrf.mxu3  ;;  %1833 = vmatpush.msra.mxu3 %v2629_v9 }
  0xc4   : > { %v3420_v4 = vpop.f32.mrf.mxu0  ;;  %v3422_v16 = vpop.f32.mrf.mxu1 }
  0xc7   : > { %612 = vmatmul.f32.gmra.mxu1 %v2991_v34  ;;  %1246 = vmatmul.f32.gmra.mxu0 %v3147_v22 }
  0xc8   : > { %841 = vmatmul.f32.gmra.mxu2 %v2991_v34  ;;  %1068 = vmatmul.f32.gmra.mxu3 %v3147_v22  ;;  %v2646_v34 = vld [vmem:[%s3996_s2 + $0x420] sm:$0xff] }
  0xc9   : > { %2058 = vmatpush.msra.mxu0 %v2646_v34 }
  0xcb   : > { %v3434_v6 = vpop.f32.mrf.mxu2  ;;  %v3436_v32 = vpop.f32.mrf.mxu3  ;;  %2059 = vmatpush.msra.mxu0 %v2645_v14 }
  0xcc   : > { %v3438_v7 = vpop.f32.mrf.mxu0  ;;  %v3440_v48 = vpop.f32.mrf.mxu1 }
  0xcf   : > { %615 = vmatmul.f32.gmra.mxu1 %v3043_v50  ;;  %1249 = vmatmul.f32.gmra.mxu0 %v3199_v42 }
  0xd0   : > { %844 = vmatmul.f32.gmra.mxu2 %v3043_v50  ;;  %1071 = vmatmul.f32.gmra.mxu3 %v3199_v42 }
  0xd3   : > { %v3458_v11 = vpop.f32.mrf.mxu2  ;;  %v3460_v50 = vpop.f32.mrf.mxu3 }
  0xd4   : > { %v411_v12 = vpop.f32.mrf.mxu0  ;;  %v429_v13 = vpop.f32.mrf.mxu1 }
  0xd5   : > { %v2643_v12 = vld [vmem:[%s3996_s2 + $0x408] sm:$0xff] }
  0xd7   : > { %618 = vmatmul.f32.gmra.mxu1 %v3095_v2  ;;  %1252 = vmatmul.f32.gmra.mxu0 %v2942_v19 }
  0xd8   : > { %847 = vmatmul.f32.gmra.mxu2 %v3095_v2  ;;  %1074 = vmatmul.f32.gmra.mxu3 %v2942_v19  ;;  %v2628_v2 = vld [vmem:[%s3996_s2 + $0x390] sm:$0xff] }
  0xd9   : > { %1834 = vmatpush.msra.mxu3 %v2628_v2  ;;  %v2626_v2 = vld [vmem:[%s3996_s2 + $0x380] sm:$0xff] }
  0xdb   : > { %v447_v24 = vpop.f32.mrf.mxu2  ;;  %v465_v25 = vpop.f32.mrf.mxu3  ;;  %1835 = vmatpush.msra.mxu3 %v2627_v55 }
  0xdc   : > { %v574_v17 = vpop.f32.mrf.mxu1  ;;  %v3472_v26 = vpop.f32.mrf.mxu0 }
  0xdd   : > { %v646_v53 = vrot.slane %v574_v17, 1  ;;  %1836 = vmatpush.msra.mxu3 %v2626_v2  ;;  %v3585_v2 = vld [vmem:[%s3562_s7 + $0x8] sm:$0xff] }
  0xdf   : > { %621 = vmatmul.f32.gmra.mxu1 %v3147_v22  ;;  %1255 = vmatmul.f32.gmra.mxu0 %v2994_v35 }
  0xe0   : > { %850 = vmatmul.f32.gmra.mxu2 %v3147_v22  ;;  %1077 = vmatmul.f32.gmra.mxu3 %v2994_v35  ;;  %v2644_v22 = vld [vmem:[%s3996_s2 + $0x410] sm:$0xff] }
  0xe1   : > { %2060 = vmatpush.msra.mxu0 %v2644_v22 }
  0xe3   : > { %v803_v29 = vpop.f32.mrf.mxu2  ;;  %v1030_v30 = vpop.f32.mrf.mxu3  ;;  %2061 = vmatpush.msra.mxu0 %v2643_v12 }
  0xe4   : > { %v577_v36 = vpop.f32.mrf.mxu1  ;;  %v3486_v39 = vpop.f32.mrf.mxu0  ;;  %v875_v59 = vrot.slane %v803_v29, 2 }
  0xe5   : > { %v647_v46 = vrot.slane %v577_v36, 1 }
  0xe7   : > { %624 = vmatmul.f32.gmra.mxu1 %v3199_v42  ;;  %1258 = vmatmul.f32.gmra.mxu0 %v3046_v51  ;;  %v695_v60 = vsel %vm672_vm0, %v646_v53, %v647_v46 }
  0xe8   : > { %853 = vmatmul.f32.gmra.mxu2 %v3199_v42  ;;  %1080 = vmatmul.f32.gmra.mxu3 %v3046_v51  ;;  %v721_v34 = vadd.f32 %v695_v60, %v3371_v37  ;;  %v2611_v37 = vld [vmem:[%s3996_s2 + $0x308] sm:$0xff] }
  0xe9   : > { %1657 = vmatpush.msra.mxu2 %v2611_v37 }
  0xeb   : > { %v806_v61 = vpop.f32.mrf.mxu2  ;;  %v1033_v62 = vpop.f32.mrf.mxu3  ;;  %1658 = vmatpush.msra.mxu2 %v2610_v58 }
  0xec   : > { %v876_v63 = vrot.slane %v806_v61, 2  ;;  %v580_v18 = vpop.f32.mrf.mxu1  ;;  %v3508_v5 = vpop.f32.mrf.mxu0 }
  0xed   : > { %v648_v9 = vrot.slane %v580_v18, 1 }
  0xee   : > { %v922_v8 = vsel %vm899_vm1, %v875_v59, %v876_v63 }
  0xef   : > { %v948_v10 = vadd.f32 %v922_v8, %v721_v34  ;;  %627 = vmatmul.f32.gmra.mxu1 %v2942_v19  ;;  %1261 = vmatmul.f32.gmra.mxu0 %v3098_v3  ;;  %v694_v14 = vsel %vm672_vm0, %v647_v46, %v648_v9  ;;  %v3569_v34 = vld [vmem:[%s3562_s7] sm:$0xff] }
  0xf0   : > { %856 = vmatmul.f32.gmra.mxu2 %v2942_v19  ;;  %1083 = vmatmul.f32.gmra.mxu3 %v3098_v3  ;;  %v722_v27 = vadd.f32 %v694_v14, %v3389_v47 }
  0xf1   : > { %v3524_v13 = vadd.f32 %v1030_v30, %v948_v10  ;;  %v2594_v30 = vld [vmem:[%s3996_s2 + $0x280] sm:$0xff] }
  0xf2   : > { %1432 = vmatpush.msra.mxu1 %v2594_v30 }
  0xf3   : > { %v809_v15 = vpop.f32.mrf.mxu2  ;;  %v1036_v24 = vpop.f32.mrf.mxu3 }
  0xf4   : > { %v877_v19 = vrot.slane %v809_v15, 2  ;;  %v583_v25 = vpop.f32.mrf.mxu1  ;;  %v3528_v17 = vpop.f32.mrf.mxu0 }
  0xf5   : > { %v649_v55 = vrot.slane %v583_v25, 1 }
  0xf6   : > { %v921_v28 = vsel %vm899_vm1, %v876_v63, %v877_v19 }
  0xf7   : > { %v949_v29 = vadd.f32 %v921_v28, %v722_v27  ;;  %630 = vmatmul.f32.gmra.mxu1 %v2994_v35  ;;  %1264 = vmatmul.f32.gmra.mxu0 %v3150_v23 }
  0xf8   : > { %859 = vmatmul.f32.gmra.mxu2 %v2994_v35  ;;  %1086 = vmatmul.f32.gmra.mxu3 %v3150_v23  ;;  %v2642_v35 = vld [vmem:[%s3996_s2 + $0x400] sm:$0xff] }
  0xf9   : > { %v3543_v47 = vadd.f32 %v1033_v62, %v949_v29  ;;  %2062 = vmatpush.msra.mxu0 %v2642_v35 }
  0xfb   : > { %v812_v36 = vpop.f32.mrf.mxu2  ;;  %v1039_v46 = vpop.f32.mrf.mxu3 }
  0xfc   : > { %v586_v22 = vpop.f32.mrf.mxu1  ;;  %v3547_v53 = vpop.f32.mrf.mxu0  ;;  %v878_v59 = vrot.slane %v812_v36, 2 }
  0xfd   : > { %v650_v54 = vrot.slane %v586_v22, 1 }
  0xff   : > { %633 = vmatmul.f32.gmra.mxu1 %v3046_v51  ;;  %1267 = vmatmul.f32.gmra.mxu0 %v3202_v43  ;;  %v692_v60 = vsel %vm672_vm0, %v649_v55, %v650_v54 }
 0x100   : > { %862 = vmatmul.f32.gmra.mxu2 %v3046_v51  ;;  %1089 = vmatmul.f32.gmra.mxu3 %v3202_v43  ;;  %v724_v8 = vadd.f32 %v692_v60, %v3420_v4 }
 0x103   : > { %v815_v61 = vpop.f32.mrf.mxu2  ;;  %v1042_v51 = vpop.f32.mrf.mxu3 }
 0x104   : > { %v879_v62 = vrot.slane %v815_v61, 2  ;;  %v589_v63 = vpop.f32.mrf.mxu1  ;;  %v3566_v18 = vpop.f32.mrf.mxu0 }
 0x105   : > { %v651_v10 = vrot.slane %v589_v63, 1 }
 0x106   : > { %v919_v9 = vsel %vm899_vm1, %v878_v59, %v879_v62 }
 0x107   : > { %v951_v12 = vadd.f32 %v919_v9, %v724_v8  ;;  %636 = vmatmul.f32.gmra.mxu1 %v3098_v3  ;;  %1270 = vmatmul.f32.gmra.mxu0 %v3569_v34  ;;  %v691_v14 = vsel %vm672_vm0, %v650_v54, %v651_v10 }
 0x108   : > { %865 = vmatmul.f32.gmra.mxu2 %v3098_v3  ;;  %1092 = vmatmul.f32.gmra.mxu3 %v3569_v34  ;;  %v725_v27 = vadd.f32 %v691_v14, %v3438_v7  ;;  %v3599_v7 = vld [vmem:[%s3562_s7 + $0x10] sm:$0xff] }
 0x109   : > { %v3578_v37 = vadd.f32 %v1039_v46, %v951_v12 }
 0x10b   : > { %v818_v15 = vpop.f32.mrf.mxu2  ;;  %v1045_v4 = vpop.f32.mrf.mxu3 }
 0x10c   : > { %v880_v24 = vrot.slane %v818_v15, 2  ;;  %v592_v19 = vpop.f32.mrf.mxu1  ;;  %v3582_v25 = vpop.f32.mrf.mxu0 }
 0x10d   : > { %v652_v35 = vrot.slane %v592_v19, 1 }
 0x10e   : > { %v918_v3 = vsel %vm899_vm1, %v879_v62, %v880_v24 }
 0x10f   : > { %v952_v28 = vadd.f32 %v918_v3, %v725_v27  ;;  %639 = vmatmul.f32.gmra.mxu1 %v3150_v23  ;;  %1273 = vmatmul.f32.gmra.mxu0 %v3585_v2 }
 0x110   : > { %868 = vmatmul.f32.gmra.mxu2 %v3150_v23  ;;  %1095 = vmatmul.f32.gmra.mxu3 %v3585_v2 }
 0x111   : > { %v3594_v29 = vadd.f32 %v1042_v51, %v952_v28 }
 0x113   : > { %v821_v30 = vpop.f32.mrf.mxu2  ;;  %v1048_v36 = vpop.f32.mrf.mxu3 }
 0x114   : > { %v595_v46 = vpop.f32.mrf.mxu1  ;;  %v3596_v22 = vpop.f32.mrf.mxu0  ;;  %v881_v23 = vrot.slane %v821_v30, 2 }
 0x115   : > { %v653_v54 = vrot.slane %v595_v46, 1 }
 0x117   : > { %642 = vmatmul.f32.gmra.mxu1 %v3202_v43  ;;  %1276 = vmatmul.f32.gmra.mxu0 %v3599_v7  ;;  %v689_v55 = vsel %vm672_vm0, %v652_v35, %v653_v54 }
 0x118   : > { %871 = vmatmul.f32.gmra.mxu2 %v3202_v43  ;;  %1098 = vmatmul.f32.gmra.mxu3 %v3599_v7  ;;  %v727_v62 = vadd.f32 %v689_v55, %v3373_v38  ;;  %v2753_v43 = vld [vmem:[%s2927_s23 + $0x30] sm:$0xff] }
 0x11b   : > { %v824_v58 = vpop.f32.mrf.mxu2  ;;  %v1051_v59 = vpop.f32.mrf.mxu3 }
 0x11c   : > { %v882_v60 = vrot.slane %v824_v58, 2  ;;  %v598_v61 = vpop.f32.mrf.mxu1  ;;  %v3607_v51 = vpop.f32.mrf.mxu0 }
 0x11d   : > { %v654_v8 = vrot.slane %v598_v61, 1 }
 0x11e   : > { %v916_v63 = vsel %vm899_vm1, %v881_v23, %v882_v60 }
 0x11f   : > { %v954_v9 = vadd.f32 %v916_v63, %v727_v62  ;;  %1433 = vmatmul.f32.vlgmr.msra.gmra.mxu1 %v3089_v0  ;;  %2063 = vmatmul.f32.vlgmr.msra.gmra.mxu0 %v2753_v43  ;;  %v688_v12 = vsel %vm672_vm0, %v653_v54, %v654_v8 }
 0x120   : > { %1837 = vmatmul.f32.vlgmr.msra.gmra.mxu3 %v2753_v43  ;;  %1659 = vmatmul.f32.vlgmr.msra.gmra.mxu2 %v2753_v43  ;;  %v728_v19 = vadd.f32 %v688_v12, %v3391_v52 }
 0x121   : > { %v3614_v10 = vadd.f32 %v1048_v36, %v954_v9 }
 0x123   : > { %v827_v14 = vpop.f32.mrf.mxu2  ;;  %v1054_v15 = vpop.f32.mrf.mxu3 }
 0x124   : > { %v883_v4 = vrot.slane %v827_v14, 2  ;;  %v601_v38 = vpop.f32.mrf.mxu1  ;;  %v3618_v24 = vpop.f32.mrf.mxu0 }
 0x125   : > { %v655_v54 = vrot.slane %v601_v38, 1  ;;  %v2754_v38 = vld [vmem:[%s2927_s23 + $0x38] sm:$0xff] }
 0x126   : > { %v915_v0 = vsel %vm899_vm1, %v882_v60, %v883_v4 }
 0x127   : > { %v955_v27 = vadd.f32 %v915_v0, %v728_v19  ;;  %1436 = vmatmul.f32.gmra.mxu1 %v3141_v20  ;;  %2066 = vmatmul.f32.gmra.mxu0 %v2988_v33 }
 0x128   : > { %1840 = vmatmul.f32.gmra.mxu3 %v2988_v33  ;;  %1662 = vmatmul.f32.gmra.mxu2 %v2988_v33 }
 0x129   : > { %v3627_v3 = vadd.f32 %v1051_v59, %v955_v27 }
 0x12b   : > { %v830_v28 = vpop.f32.mrf.mxu2  ;;  %v1057_v30 = vpop.f32.mrf.mxu3 }
 0x12c   : > { %v604_v36 = vpop.f32.mrf.mxu1  ;;  %v3629_v46 = vpop.f32.mrf.mxu0  ;;  %v884_v20 = vrot.slane %v830_v28, 2 }
 0x12d   : > { %v656_v52 = vrot.slane %v604_v36, 1  ;;  %v2755_v36 = vld [vmem:[%s2927_s23 + $0x40] sm:$0xff] }
 0x12f   : > { %1439 = vmatmul.f32.gmra.mxu1 %v3193_v40  ;;  %2069 = vmatmul.f32.gmra.mxu0 %v3040_v49  ;;  %v686_v33 = vsel %vm672_vm0, %v655_v54, %v656_v52 }
 0x130   : > { %1843 = vmatmul.f32.gmra.mxu3 %v3040_v49  ;;  %1665 = vmatmul.f32.gmra.mxu2 %v3040_v49  ;;  %v730_v60 = vadd.f32 %v686_v33, %v3422_v16 }
 0x133   : > { %v833_v35 = vpop.f32.mrf.mxu2  ;;  %v1060_v23 = vpop.f32.mrf.mxu3 }
 0x134   : > { %v885_v55 = vrot.slane %v833_v35, 2  ;;  %v607_v58 = vpop.f32.mrf.mxu1  ;;  %v3637_v59 = vpop.f32.mrf.mxu0 }
 0x135   : > { %v657_v61 = vrot.slane %v607_v58, 1 }
 0x136   : > { %v913_v40 = vsel %vm899_vm1, %v884_v20, %v885_v55 }
 0x137   : > { %v957_v62 = vadd.f32 %v913_v40, %v730_v60  ;;  %1442 = vmatmul.f32.gmra.mxu1 %v2753_v43  ;;  %2072 = vmatmul.f32.gmra.mxu0 %v3092_v1  ;;  %v685_v63 = vsel %vm672_vm0, %v656_v52, %v657_v61 }
 0x138   : > { %1846 = vmatmul.f32.gmra.mxu3 %v3092_v1  ;;  %1668 = vmatmul.f32.gmra.mxu2 %v3092_v1  ;;  %v731_v43 = vadd.f32 %v685_v63, %v3440_v48  ;;  %v2756_v63 = vld [vmem:[%s2927_s23 + $0x60] sm:$0xff] }
 0x139   : > { %v3645_v49 = vadd.f32 %v1057_v30, %v957_v62 }
 0x13b   : > { %v836_v8 = vpop.f32.mrf.mxu2  ;;  %v1063_v16 = vpop.f32.mrf.mxu3 }
 0x13c   : > { %v886_v9 = vrot.slane %v836_v8, 2  ;;  %v610_v12 = vpop.f32.mrf.mxu1  ;;  %v3649_v14 = vpop.f32.mrf.mxu0 }
 0x13d   : > { %v658_v52 = vrot.slane %v610_v12, 1 }
 0x13e   : > { %v912_v15 = vsel %vm899_vm1, %v885_v55, %v886_v9 }
 0x13f   : > { %v958_v4 = vadd.f32 %v912_v15, %v731_v43  ;;  %1445 = vmatmul.f32.gmra.mxu1 %v2754_v38  ;;  %2075 = vmatmul.f32.gmra.mxu0 %v3144_v21 }
 0x140   : > { %1849 = vmatmul.f32.gmra.mxu3 %v3144_v21  ;;  %1671 = vmatmul.f32.gmra.mxu2 %v3144_v21 }
 0x141   : > { %v3658_v19 = vadd.f32 %v1060_v23, %v958_v4 }
 0x143   : > { %v839_v0 = vpop.f32.mrf.mxu2  ;;  %v1066_v27 = vpop.f32.mrf.mxu3 }
 0x144   : > { %v613_v28 = vpop.f32.mrf.mxu1  ;;  %v3660_v30 = vpop.f32.mrf.mxu0  ;;  %v887_v54 = vrot.slane %v839_v0, 2  ;;  %v2757_v0 = vld [vmem:[%s2927_s23 + $0x68] sm:$0xff] }
 0x145   : > { %v659_v48 = vrot.slane %v613_v28, 1 }
 0x147   : > { %1448 = vmatmul.f32.gmra.mxu1 %v2755_v36  ;;  %2078 = vmatmul.f32.gmra.mxu0 %v3196_v41  ;;  %v683_v20 = vsel %vm672_vm0, %v658_v52, %v659_v48 }
 0x148   : > { %1852 = vmatmul.f32.gmra.mxu3 %v3196_v41  ;;  %1674 = vmatmul.f32.gmra.mxu2 %v3196_v41  ;;  %v733_v60 = vadd.f32 %v683_v20, %v3382_v44 }
 0x14b   : > { %v842_v33 = vpop.f32.mrf.mxu2  ;;  %v1069_v35 = vpop.f32.mrf.mxu3 }
 0x14c   : > { %v888_v23 = vrot.slane %v842_v33, 2  ;;  %v616_v55 = vpop.f32.mrf.mxu1  ;;  %v3668_v58 = vpop.f32.mrf.mxu0 }
 0x14d   : > { %v660_v61 = vrot.slane %v616_v55, 1 }
 0x14e   : > { %v910_v40 = vsel %vm899_vm1, %v887_v54, %v888_v23 }
 0x14f   : > { %v960_v62 = vadd.f32 %v910_v40, %v733_v60  ;;  %1451 = vmatmul.f32.gmra.mxu1 %v3092_v1  ;;  %2081 = vmatmul.f32.gmra.mxu0 %v2756_v63  ;;  %v682_v16 = vsel %vm672_vm0, %v659_v48, %v660_v61 }
 0x150   : > { %1855 = vmatmul.f32.gmra.mxu3 %v2756_v63  ;;  %1677 = vmatmul.f32.gmra.mxu2 %v2756_v63  ;;  %v734_v4 = vadd.f32 %v682_v16, %v3406_v56  ;;  %v2758_v56 = vld [vmem:[%s2927_s23 + $0x70] sm:$0xff] }
 0x151   : > { %v3675_v8 = vadd.f32 %v1066_v27, %v960_v62 }
 0x153   : > { %v845_v9 = vpop.f32.mrf.mxu2  ;;  %v1072_v12 = vpop.f32.mrf.mxu3 }
 0x154   : > { %v889_v44 = vrot.slane %v845_v9, 2  ;;  %v619_v43 = vpop.f32.mrf.mxu1  ;;  %v3679_v15 = vpop.f32.mrf.mxu0  ;;  %v2759_v9 = vld [vmem:[%s2927_s23 + $0x78] sm:$0xff] }
 0x155   : > { %v661_v20 = vrot.slane %v619_v43, 1 }
 0x156   : > { %v909_v1 = vsel %vm899_vm1, %v888_v23, %v889_v44 }
 0x157   : > { %v961_v38 = vadd.f32 %v909_v1, %v734_v4  ;;  %1454 = vmatmul.f32.gmra.mxu1 %v3144_v21  ;;  %2084 = vmatmul.f32.gmra.mxu0 %v2757_v0 }
 0x158   : > { %1858 = vmatmul.f32.gmra.mxu3 %v2757_v0  ;;  %1680 = vmatmul.f32.gmra.mxu2 %v2757_v0 }
 0x159   : > { %v3686_v27 = vadd.f32 %v1069_v35, %v961_v38 }
 0x15b   : > { %v848_v28 = vpop.f32.mrf.mxu2  ;;  %v1075_v48 = vpop.f32.mrf.mxu3 }
 0x15c   : > { %v622_v36 = vpop.f32.mrf.mxu1  ;;  %v3688_v52 = vpop.f32.mrf.mxu0  ;;  %v890_v21 = vrot.slane %v848_v28, 2 }
 0x15d   : > { %v662_v54 = vrot.slane %v622_v36, 1 }
 0x15f   : > { %1457 = vmatmul.f32.gmra.mxu1 %v3196_v41  ;;  %2087 = vmatmul.f32.gmra.mxu0 %v2758_v56  ;;  %v680_v33 = vsel %vm672_vm0, %v661_v20, %v662_v54  ;;  %v2760_v20 = vld [vmem:[%s2927_s23 + $0x80] sm:$0xff] }
 0x160   : > { %1861 = vmatmul.f32.gmra.mxu3 %v2758_v56  ;;  %1683 = vmatmul.f32.gmra.mxu2 %v2758_v56  ;;  %v736_v61 = vadd.f32 %v680_v33, %v3434_v6 }
 0x163   : > { %v851_v35 = vpop.f32.mrf.mxu2  ;;  %v1078_v23 = vpop.f32.mrf.mxu3 }
 0x164   : > { %v891_v55 = vrot.slane %v851_v35, 2  ;;  %v625_v60 = vpop.f32.mrf.mxu1  ;;  %v3694_v40 = vpop.f32.mrf.mxu0 }
 0x165   : > { %v663_v62 = vrot.slane %v625_v60, 1 }
 0x166   : > { %v907_v41 = vsel %vm899_vm1, %v890_v21, %v891_v55 }
 0x167   : > { %v963_v16 = vadd.f32 %v907_v41, %v736_v61  ;;  %1460 = vmatmul.f32.gmra.mxu1 %v2756_v63  ;;  %2090 = vmatmul.f32.gmra.mxu0 %v2759_v9  ;;  %v679_v44 = vsel %vm672_vm0, %v662_v54, %v663_v62 }
 0x168   : > { %1864 = vmatmul.f32.gmra.mxu3 %v2759_v9  ;;  %1686 = vmatmul.f32.gmra.mxu2 %v2759_v9  ;;  %v737_v28 = vadd.f32 %v679_v44, %v3458_v11 }
 0x169   : > { %v3700_v12 = vadd.f32 %v1075_v48, %v963_v16 }
 0x16b   : > { %v854_v43 = vpop.f32.mrf.mxu2  ;;  %v1081_v4 = vpop.f32.mrf.mxu3 }
 0x16c   : > { %v892_v1 = vrot.slane %v854_v43, 2  ;;  %v628_v6 = vpop.f32.mrf.mxu1  ;;  %v3704_v38 = vpop.f32.mrf.mxu0 }
 0x16d   : > { %v664_v11 = vrot.slane %v628_v6, 1 }
 0x16e   : > { %v906_v63 = vsel %vm899_vm1, %v891_v55, %v892_v1 }
 0x16f   : > { %v964_v36 = vadd.f32 %v906_v63, %v737_v28  ;;  %1463 = vmatmul.f32.gmra.mxu1 %v2757_v0  ;;  %2093 = vmatmul.f32.gmra.mxu0 %v2760_v20 }
 0x170   : > { %1867 = vmatmul.f32.gmra.mxu3 %v2760_v20  ;;  %1689 = vmatmul.f32.gmra.mxu2 %v2760_v20 }
 0x171   : > { %v3710_v48 = vadd.f32 %v1078_v23, %v964_v36 }
 0x173   : > { %v857_v54 = vpop.f32.mrf.mxu2  ;;  %v1084_v21 = vpop.f32.mrf.mxu3 }
 0x174   : > { %v631_v33 = vpop.f32.mrf.mxu1  ;;  %v3712_v35 = vpop.f32.mrf.mxu0  ;;  %v893_v0 = vrot.slane %v857_v54, 2 }
 0x175   : > { %v665_v60 = vrot.slane %v631_v33, 1 }
 0x177   : > { %1466 = vmatmul.f32.gmra.mxu1 %v2758_v56  ;;  %2096 = vmatmul.f32.gmra.mxu0 %v3199_v42  ;;  %v677_v23 = vsel %vm672_vm0, %v664_v11, %v665_v60 }
 0x178   : > { %1870 = vmatmul.f32.gmra.mxu3 %v3199_v42  ;;  %1692 = vmatmul.f32.gmra.mxu2 %v3199_v42  ;;  %v739_v56 = vadd.f32 %v677_v23, %v3384_v45  ;;  %v2761_v42 = vld [vmem:[%s2927_s23 + $0x90] sm:$0xff] }
 0x17b   : > { %v860_v55 = vpop.f32.mrf.mxu2  ;;  %v1087_v61 = vpop.f32.mrf.mxu3 }
 0x17c   : > { %v894_v41 = vrot.slane %v860_v55, 2  ;;  %v634_v62 = vpop.f32.mrf.mxu1  ;;  %v3719_v16 = vpop.f32.mrf.mxu0 }
 0x17d   : > { %v666_v43 = vrot.slane %v634_v62, 1 }
 0x17e   : > { %v904_v44 = vsel %vm899_vm1, %v893_v0, %v894_v41 }
 0x17f   : > { %v966_v4 = vadd.f32 %v904_v44, %v739_v56  ;;  %1469 = vmatmul.f32.gmra.mxu1 %v2759_v9  ;;  %2099 = vmatmul.f32.gmra.mxu0 %v2761_v42  ;;  %v676_v6 = vsel %vm672_vm0, %v665_v60, %v666_v43  ;;  %v2763_v44 = vld [vmem:[%s2927_s23 + $0x88] sm:$0xff] }
 0x180   : > { %1873 = vmatmul.f32.gmra.mxu3 %v2761_v42  ;;  %1695 = vmatmul.f32.gmra.mxu2 %v2761_v42  ;;  %v740_v33 = vadd.f32 %v676_v6, %v3408_v57  ;;  %v2764_v57 = vld [vmem:[%s2927_s23 + $0xa0] sm:$0xff] }
 0x181   : > { %v3725_v1 = vadd.f32 %v1084_v21, %v966_v4  ;;  %v2762_v21 = vld [vmem:[%s2927_s23 + $0x98] sm:$0xff] }
 0x183   : > { %v863_v28 = vpop.f32.mrf.mxu2  ;;  %v1090_v63 = vpop.f32.mrf.mxu3 }
 0x184   : > { %v895_v36 = vrot.slane %v863_v28, 2  ;;  %v637_v45 = vpop.f32.mrf.mxu1  ;;  %v3729_v54 = vpop.f32.mrf.mxu0 }
 0x186   : > { %v903_v9 = vsel %vm899_vm1, %v894_v41, %v895_v36  ;;  %v667_v41 = vrot.slane %v637_v45, 1  ;;  %v2765_v45 = vld [vmem:[%s2927_s23 + $0xa8] sm:$0xff] }
 0x187   : > { %v967_v11 = vadd.f32 %v903_v9, %v740_v33  ;;  %1472 = vmatmul.f32.gmra.mxu1 %v2760_v20  ;;  %2102 = vmatmul.f32.gmra.mxu0 %v2762_v21 }
 0x188   : > { %1876 = vmatmul.f32.gmra.mxu3 %v2762_v21  ;;  %1698 = vmatmul.f32.gmra.mxu2 %v2762_v21 }
 0x189   : > { %v3735_v60 = vadd.f32 %v1087_v61, %v967_v11 }
 0x18b   : > { %v866_v0 = vpop.f32.mrf.mxu2  ;;  %v1093_v23 = vpop.f32.mrf.mxu3 }
 0x18c   : > { %v640_v55 = vpop.f32.mrf.mxu1  ;;  %v3737_v62 = vpop.f32.mrf.mxu0  ;;  %v896_v20 = vrot.slane %v866_v0, 2 }
 0x18d   : > { %v668_v56 = vrot.slane %v640_v55, 1 }
 0x18f   : > { %1475 = vmatmul.f32.gmra.mxu1 %v2763_v44  ;;  %2105 = vmatmul.f32.gmra.mxu0 %v2764_v57  ;;  %v674_v43 = vsel %vm672_vm0, %v667_v41, %v668_v56 }
 0x190   : > { %1879 = vmatmul.f32.gmra.mxu3 %v2764_v57  ;;  %1701 = vmatmul.f32.gmra.mxu2 %v2764_v57  ;;  %v742_v36 = vadd.f32 %v674_v43, %v3436_v32 }
 0x193   : > { %v869_v61 = vpop.f32.mrf.mxu2  ;;  %v1096_v4 = vpop.f32.mrf.mxu3 }
 0x194   : > { %v897_v6 = vrot.slane %v869_v61, 2  ;;  %v643_v28 = vpop.f32.mrf.mxu1  ;;  %v3743_v63 = vpop.f32.mrf.mxu0 }
 0x195   : > { %v669_v9 = vrot.slane %v643_v28, 1 }
 0x196   : > { %v901_v33 = vsel %vm899_vm1, %v896_v20, %v897_v6 }
 0x197   : > { %v969_v11 = vadd.f32 %v901_v33, %v742_v36  ;;  %1478 = vmatmul.f32.gmra.mxu1 %v2761_v42  ;;  %2108 = vmatmul.f32.gmra.mxu0 %v2765_v45  ;;  %v673_v55 = vsel %vm672_vm0, %v668_v56, %v669_v9  ;;  %v2766_v36 = vld [vmem:[%s2927_s23 + $0xb0] sm:$0xff]  ;;  %v1280_v56 = vrot.slane %v3472_v26, 1  ;;  %v1281_v33 = vrot.slane %v3486_v39, 1 }
 0x198   : > { %1882 = vmatmul.f32.gmra.mxu3 %v2765_v45  ;;  %1704 = vmatmul.f32.gmra.mxu2 %v2765_v45  ;;  %v743_v61 = vadd.f32 %v673_v55, %v3460_v50 }
 0x199   : > { %v3749_v0 = vadd.f32 %v1093_v23, %v969_v11 }
 0x19b   : > { %v872_v44 = vpop.f32.mrf.mxu2  ;;  %v1099_v41 = vpop.f32.mrf.mxu3 }
 0x19c   : > { %v898_v32 = vrot.slane %v872_v44, 2  ;;  %v1434_v43 = vpop.f32.mrf.mxu1  ;;  %v2064_v20 = vpop.f32.mrf.mxu0  ;;  %v1326_v44 = vsel %vm672_vm0, %v1280_v56, %v1281_v33  ;;  %v3766_v41 = vld [vmem:[%s2927_s23 + $0xb8] sm:$0xff]  ;;  %s2527_s23 = sshll.u32 %s297_s10, 3 }
 0x19d   : > { %v1506_v55 = vrot.slane %v1434_v43, 2  ;;  %v1352_v26 = vadd.f32 %v1326_v44, %v3524_v13  ;;  %s3789_s12 = scalar_lea.vmem %s3997_s3, %s2527_s23 }
 0x19e   : > { %v900_v42 = vsel %vm899_vm1, %v897_v6, %v898_v32  ;;  %v1282_v32 = vrot.slane %v3508_v5, 1 }
 0x19f   : > { %v970_v28 = vadd.f32 %v900_v42, %v743_v61  ;;  %1481 = vmatmul.f32.gmra.mxu1 %v2762_v21  ;;  %2111 = vmatmul.f32.gmra.mxu0 %v2766_v36  ;;  %v2136_v61 = vrot.slane %v2064_v20, 2 }
 0x1a0   : > { %1885 = vmatmul.f32.gmra.mxu3 %v2766_v36  ;;  %1707 = vmatmul.f32.gmra.mxu2 %v2766_v36 }
 0x1a1   : > { %v3758_v23 = vadd.f32 %v1096_v4, %v970_v28 }
 0x1a3   : > { %3999 = vst [vmem:[#allocation3_spill] sm:$0xff] %v3758_v23  ;;  %v1838_v9 = vpop.f32.mrf.mxu3  ;;  %v1660_v50 = vpop.f32.mrf.mxu2 }
 0x1a4   : > { %v1437_v11 = vpop.f32.mrf.mxu1  ;;  %v2067_v6 = vpop.f32.mrf.mxu0  ;;  %v1910_v42 = vrot.slane %v1838_v9, 1 }
 0x1a5   : > { %v1507_v21 = vrot.slane %v1437_v11, 2  ;;  %v2137_v28 = vrot.slane %v2067_v6, 2 }
 0x1a7   : > { %1484 = vmatmul.f32.gmra.mxu1 %v2764_v57  ;;  %2114 = vmatmul.f32.gmra.mxu0 %v3766_v41  ;;  %v1552_v39 = vsel %vm899_vm1, %v1506_v55, %v1507_v21  ;;  %v2182_v9 = vsel %vm899_vm1, %v2136_v61, %v2137_v28 }
 0x1a8   : > { %1888 = vmatmul.f32.gmra.mxu3 %v3766_v41  ;;  %1710 = vmatmul.f32.gmra.mxu2 %v3766_v41  ;;  %v1578_v4 = vadd.f32 %v1552_v39, %v1352_v26  ;;  %v1325_v26 = vsel %vm672_vm0, %v1281_v33, %v1282_v32 }
 0x1a9   : > { %v1353_v5 = vadd.f32 %v1325_v26, %v3543_v47 }
 0x1aa   : > { %v1756_v44 = vadd.f32 %v1660_v50, %v1578_v4 }
 0x1ab   : > { %v1841_v57 = vpop.f32.mrf.mxu3  ;;  %v1663_v43 = vpop.f32.mrf.mxu2 }
 0x1ac   : > { %v1911_v56 = vrot.slane %v1841_v57, 1  ;;  %v1440_v13 = vpop.f32.mrf.mxu1  ;;  %v2070_v11 = vpop.f32.mrf.mxu0 }
 0x1ad   : > { %v1508_v55 = vrot.slane %v1440_v13, 2  ;;  %v2138_v50 = vrot.slane %v2070_v11, 2  ;;  %v1283_v11 = vrot.slane %v3528_v17, 1 }
 0x1ae   : > { %v1956_v23 = vsel %vm672_vm0, %v1910_v42, %v1911_v56 }
 0x1af   : > { %v1982_v39 = vadd.f32 %v1956_v23, %v1756_v44  ;;  %1487 = vmatmul.f32.gmra.mxu1 %v2765_v45  ;;  %2117 = vmatmul.f32.gmra.mxu0 %v3569_v34  ;;  %v1551_v20 = vsel %vm899_vm1, %v1507_v21, %v1508_v55  ;;  %v2181_v42 = vsel %vm899_vm1, %v2137_v28, %v2138_v50  ;;  %v1284_v44 = vrot.slane %v3547_v53, 1 }
 0x1b0   : > { %1891 = vmatmul.f32.gmra.mxu3 %v3569_v34  ;;  %1713 = vmatmul.f32.gmra.mxu2 %v3569_v34  ;;  %v1579_v23 = vadd.f32 %v1551_v20, %v1353_v5 }
 0x1b1   : > { %v2208_v45 = vadd.f32 %v2182_v9, %v1982_v39 }
 0x1b2   : > { %v1757_v32 = vadd.f32 %v1663_v43, %v1579_v23  ;;  %v1323_v23 = vsel %vm672_vm0, %v1283_v11, %v1284_v44 }
 0x1b3   : > { %2272 = vst [vmem:[%s3789_s12] sm:$0xff] %v2208_v45  ;;  %v1844_v47 = vpop.f32.mrf.mxu3  ;;  %v1666_v33 = vpop.f32.mrf.mxu2  ;;  %v2310_v43 = vmul.f32 %v2208_v45, %v2208_v45  ;;  %v1355_v17 = vadd.f32 %v1323_v23, %v3578_v37  ;;  %v336_v37 = vld [vmem:[%s3562_s7 + $0x18] sm:$0xff] }
 0x1b4   : > { %v1912_v6 = vrot.slane %v1844_v47, 1  ;;  %v1443_v21 = vpop.f32.mrf.mxu1  ;;  %v2073_v4 = vpop.f32.mrf.mxu0  ;;  %v1285_v47 = vrot.slane %v3566_v18, 1 }
 0x1b5   : > { %v1509_v9 = vrot.slane %v1443_v21, 2 }
 0x1b6   : > { %v1955_v57 = vsel %vm672_vm0, %v1911_v56, %v1912_v6  ;;  %v2139_v6 = vrot.slane %v2073_v4, 2 }
 0x1b7   : > { %v1983_v61 = vadd.f32 %v1955_v57, %v1757_v32  ;;  %1490 = vmatmul.f32.gmra.mxu1 %v2766_v36  ;;  %2120 = vmatmul.f32.gmra.mxu0 %v3585_v2 }
 0x1b8   : > { %1894 = vmatmul.f32.gmra.mxu3 %v3585_v2  ;;  %1716 = vmatmul.f32.gmra.mxu2 %v3585_v2 }
 0x1b9   : > { %v2209_v13 = vadd.f32 %v2181_v42, %v1983_v61 }
 0x1bb   : > { %2273 = vst [vmem:[%s3789_s12 + $0x8] sm:$0xff] %v2209_v13  ;;  %v2288_v55 = vadd.f32 %v2209_v13, %v2208_v45  ;;  %v2311_v56 = vmul.f32 %v2209_v13, %v2209_v13  ;;  %v1847_v26 = vpop.f32.mrf.mxu3  ;;  %v1669_v36 = vpop.f32.mrf.mxu2 }
 0x1bc   : > { %v1446_v39 = vpop.f32.mrf.mxu1  ;;  %v2076_v5 = vpop.f32.mrf.mxu0  ;;  %v1913_v21 = vrot.slane %v1847_v26, 1 }
 0x1bd   : > { %v2326_v20 = vadd.f32 %v2311_v56, %v2310_v43  ;;  %v1510_v28 = vrot.slane %v1446_v39, 2  ;;  %v1322_v43 = vsel %vm672_vm0, %v1284_v44, %v1285_v47 }
 0x1be   : > { %v1356_v18 = vadd.f32 %v1322_v43, %v3594_v29 }
 0x1bf   : > { %1493 = vmatmul.f32.gmra.mxu1 %v3766_v41  ;;  %2123 = vmatmul.f32.gmra.mxu0 %v3599_v7  ;;  %v1549_v53 = vsel %vm899_vm1, %v1509_v9, %v1510_v28  ;;  %v2140_v41 = vrot.slane %v2076_v5, 2 }
 0x1c0   : > { %1897 = vmatmul.f32.gmra.mxu3 %v3599_v7  ;;  %1719 = vmatmul.f32.gmra.mxu2 %v3599_v7  ;;  %v1581_v45 = vadd.f32 %v1549_v53, %v1355_v17 }
 0x1c1   : > { %v2179_v26 = vsel %vm899_vm1, %v2139_v6, %v2140_v41 }
 0x1c2   : > { %v1759_v42 = vadd.f32 %v1669_v36, %v1581_v45  ;;  %v337_v45 = vld [vmem:[%s3562_s7 + $0x20] sm:$0xff] }
 0x1c3   : > { %v1850_v33 = vpop.f32.mrf.mxu3  ;;  %v1672_v50 = vpop.f32.mrf.mxu2 }
 0x1c4   : > { %v1914_v32 = vrot.slane %v1850_v33, 1  ;;  %v1449_v57 = vpop.f32.mrf.mxu1  ;;  %v2079_v61 = vpop.f32.mrf.mxu0 }
 0x1c5   : > { %v1511_v13 = vrot.slane %v1449_v57, 2  ;;  %v1286_v57 = vrot.slane %v3582_v25, 1 }
 0x1c6   : > { %v1953_v11 = vsel %vm672_vm0, %v1913_v21, %v1914_v32 }
 0x1c7   : > { %v1985_v56 = vadd.f32 %v1953_v11, %v1759_v42  ;;  %1496 = vmatmul.f32.gmra.mxu1 %v3569_v34  ;;  %2126 = vmatmul.f32.gmra.mxu0 %v336_v37  ;;  %v1548_v4 = vsel %vm899_vm1, %v1510_v28, %v1511_v13  ;;  %v2141_v34 = vrot.slane %v2079_v61, 2  ;;  %v1287_v61 = vrot.slane %v3596_v22, 1  ;;  %v338_v11 = vld [vmem:[%s3562_s7 + $0x28] sm:$0xff] }
 0x1c8   : > { %1900 = vmatmul.f32.gmra.mxu3 %v336_v37  ;;  %1722 = vmatmul.f32.gmra.mxu2 %v336_v37  ;;  %v1582_v39 = vadd.f32 %v1548_v4, %v1356_v18  ;;  %v1288_v4 = vrot.slane %v3607_v51, 1 }
 0x1c9   : > { %v2211_v36 = vadd.f32 %v2179_v26, %v1985_v56 }
 0x1ca   : > { %v1760_v28 = vadd.f32 %v1672_v50, %v1582_v39 }
 0x1cb   : > { %2274 = vst [vmem:[%s3789_s12 + $0x10] sm:$0xff] %v2211_v36  ;;  %v2289_v5 = vadd.f32 %v2288_v55, %v2211_v36  ;;  %v2312_v44 = vmul.f32 %v2211_v36, %v2211_v36  ;;  %v1853_v9 = vpop.f32.mrf.mxu3  ;;  %v1675_v23 = vpop.f32.mrf.mxu2  ;;  %v2178_v55 = vsel %vm899_vm1, %v2140_v41, %v2141_v34  ;;  %v1320_v41 = vsel %vm672_vm0, %v1286_v57, %v1287_v61 }
 0x1cc   : > { %v1915_v17 = vrot.slane %v1853_v9, 1  ;;  %v1452_v29 = vpop.f32.mrf.mxu1  ;;  %v2082_v53 = vpop.f32.mrf.mxu0  ;;  %v1358_v25 = vadd.f32 %v1320_v41, %v3614_v10  ;;  %v1290_v41 = vrot.slane %v3629_v46, 1  ;;  %v1291_v46 = vrot.slane %v3637_v59, 1 }
 0x1cd   : > { %v2327_v47 = vadd.f32 %v2326_v20, %v2312_v44  ;;  %v1512_v43 = vrot.slane %v1452_v29, 2  ;;  %v2142_v39 = vrot.slane %v2082_v53, 2  ;;  %v1319_v29 = vsel %vm672_vm0, %v1287_v61, %v1288_v4 }
 0x1ce   : > { %v1952_v33 = vsel %vm672_vm0, %v1914_v32, %v1915_v17  ;;  %v1359_v51 = vadd.f32 %v1319_v29, %v3627_v3 }
 0x1cf   : > { %v1986_v6 = vadd.f32 %v1952_v33, %v1760_v28  ;;  %1499 = vmatmul.f32.gmra.mxu1 %v3585_v2  ;;  %2129 = vmatmul.f32.gmra.mxu0 %v337_v45 }
 0x1d0   : > { %1903 = vmatmul.f32.gmra.mxu3 %v337_v45  ;;  %1725 = vmatmul.f32.gmra.mxu2 %v337_v45 }
 0x1d1   : > { %v2212_v21 = vadd.f32 %v2178_v55, %v1986_v6 }
 0x1d3   : > { %2275 = vst [vmem:[%s3789_s12 + $0x18] sm:$0xff] %v2212_v21  ;;  %v2290_v20 = vadd.f32 %v2289_v5, %v2212_v21  ;;  %v2313_v50 = vmul.f32 %v2212_v21, %v2212_v21  ;;  %v1856_v37 = vpop.f32.mrf.mxu3  ;;  %v1678_v32 = vpop.f32.mrf.mxu2 }
 0x1d4   : > { %v1455_v42 = vpop.f32.mrf.mxu1  ;;  %v2085_v13 = vpop.f32.mrf.mxu0  ;;  %v1916_v5 = vrot.slane %v1856_v37, 1 }
 0x1d5   : > { %v2328_v2 = vadd.f32 %v2327_v47, %v2313_v50  ;;  %v1513_v56 = vrot.slane %v1455_v42, 2  ;;  %v2143_v44 = vrot.slane %v2085_v13, 2 }
 0x1d7   : > { %1502 = vmatmul.f32.gmra.mxu1 %v3599_v7  ;;  %2132 = vmatmul.f32.gmra.mxu0 %v338_v11  ;;  %v1546_v22 = vsel %vm899_vm1, %v1512_v43, %v1513_v56  ;;  %v2176_v47 = vsel %vm899_vm1, %v2142_v39, %v2143_v44 }
 0x1d8   : > { %1906 = vmatmul.f32.gmra.mxu3 %v338_v11  ;;  %1728 = vmatmul.f32.gmra.mxu2 %v338_v11  ;;  %v1584_v18 = vadd.f32 %v1546_v22, %v1358_v25 }
 0x1da   : > { %v1762_v34 = vadd.f32 %v1678_v32, %v1584_v18 }
 0x1db   : > { %v1859_v26 = vpop.f32.mrf.mxu3  ;;  %v1681_v36 = vpop.f32.mrf.mxu2 }
 0x1dc   : > { %v1917_v9 = vrot.slane %v1859_v26, 1  ;;  %v1458_v23 = vpop.f32.mrf.mxu1  ;;  %v2088_v7 = vpop.f32.mrf.mxu0 }
 0x1dd   : > { %v1514_v17 = vrot.slane %v1458_v23, 2  ;;  %v2144_v50 = vrot.slane %v2088_v7, 2 }
 0x1de   : > { %v1950_v10 = vsel %vm672_vm0, %v1916_v5, %v1917_v9 }
 0x1df   : > { %v1988_v45 = vadd.f32 %v1950_v10, %v1762_v34  ;;  %v1545_v53 = vsel %vm899_vm1, %v1513_v56, %v1514_v17  ;;  %v2175_v43 = vsel %vm899_vm1, %v2143_v44, %v2144_v50 }
 0x1e0   : > { %v1585_v33 = vadd.f32 %v1545_v53, %v1359_v51 }
 0x1e1   : > { %v2214_v28 = vadd.f32 %v2176_v47, %v1988_v45 }
 0x1e2   : > { %v1763_v3 = vadd.f32 %v1681_v36, %v1585_v33  ;;  %v1316_v33 = vsel %vm672_vm0, %v1290_v41, %v1291_v46 }
 0x1e3   : > { %2276 = vst [vmem:[%s3789_s12 + $0x20] sm:$0xff] %v2214_v28  ;;  %v2291_v6 = vadd.f32 %v2290_v20, %v2214_v28  ;;  %v2314_v55 = vmul.f32 %v2214_v28, %v2214_v28  ;;  %v1862_v21 = vpop.f32.mrf.mxu3  ;;  %v1684_v57 = vpop.f32.mrf.mxu2  ;;  %v1289_v20 = vrot.slane %v3618_v24, 1  ;;  %v1362_v59 = vadd.f32 %v1316_v33, %v3658_v19 }
 0x1e4   : > { %v1918_v37 = vrot.slane %v1862_v21, 1  ;;  %v1461_v61 = vpop.f32.mrf.mxu1  ;;  %v2091_v32 = vpop.f32.mrf.mxu0 }
 0x1e5   : > { %v2329_v42 = vadd.f32 %v2328_v2, %v2314_v55  ;;  %v1515_v39 = vrot.slane %v1461_v61, 2  ;;  %v2145_v17 = vrot.slane %v2091_v32, 2 }
 0x1e6   : > { %v1949_v13 = vsel %vm672_vm0, %v1917_v9, %v1918_v37  ;;  %v1317_v9 = vsel %vm672_vm0, %v1289_v20, %v1290_v41 }
 0x1e7   : > { %v1989_v11 = vadd.f32 %v1949_v13, %v1763_v3  ;;  %v1361_v44 = vadd.f32 %v1317_v9, %v3645_v49 }
 0x1e9   : > { %v2215_v56 = vadd.f32 %v2175_v43, %v1989_v11 }
 0x1eb   : > { %2277 = vst [vmem:[%s3789_s12 + $0x28] sm:$0xff] %v2215_v56  ;;  %v2292_v25 = vadd.f32 %v2291_v6, %v2215_v56  ;;  %v2315_v22 = vmul.f32 %v2215_v56, %v2215_v56  ;;  %v1865_v18 = vpop.f32.mrf.mxu3  ;;  %v1687_v4 = vpop.f32.mrf.mxu2 }
 0x1ec   : > { %v1464_v26 = vpop.f32.mrf.mxu1  ;;  %v2094_v2 = vpop.f32.mrf.mxu0  ;;  %v1919_v10 = vrot.slane %v1865_v18, 1 }
 0x1ed   : > { %v2330_v36 = vadd.f32 %v2329_v42, %v2315_v22  ;;  %v1516_v5 = vrot.slane %v1464_v26, 2  ;;  %v2146_v29 = vrot.slane %v2094_v2, 2 }
 0x1ef   : > { %v1543_v24 = vsel %vm899_vm1, %v1515_v39, %v1516_v5  ;;  %v2173_v21 = vsel %vm899_vm1, %v2145_v17, %v2146_v29 }
 0x1f0   : > { %v1587_v23 = vadd.f32 %v1543_v24, %v1361_v44 }
 0x1f2   : > { %v1765_v47 = vadd.f32 %v1687_v4, %v1587_v23  ;;  %v1293_v4 = vrot.slane %v3660_v30, 1  ;;  %v1294_v30 = vrot.slane %v3668_v58, 1 }
 0x1f3   : > { %v1868_v7 = vpop.f32.mrf.mxu3  ;;  %v1690_v34 = vpop.f32.mrf.mxu2 }
 0x1f4   : > { %v1920_v45 = vrot.slane %v1868_v7, 1  ;;  %v1467_v51 = vpop.f32.mrf.mxu1  ;;  %v2097_v53 = vpop.f32.mrf.mxu0 }
 0x1f5   : > { %v1517_v28 = vrot.slane %v1467_v51, 2  ;;  %v2147_v3 = vrot.slane %v2097_v53, 2 }
 0x1f6   : > { %v1947_v49 = vsel %vm672_vm0, %v1919_v10, %v1920_v45 }
 0x1f7   : > { %v1991_v6 = vadd.f32 %v1947_v49, %v1765_v47  ;;  %v1542_v55 = vsel %vm899_vm1, %v1516_v5, %v1517_v28  ;;  %v2172_v22 = vsel %vm899_vm1, %v2146_v29, %v2147_v3 }
 0x1f8   : > { %v1588_v50 = vadd.f32 %v1542_v55, %v1362_v59 }
 0x1f9   : > { %v2217_v57 = vadd.f32 %v2173_v21, %v1991_v6  ;;  %v1313_v6 = vsel %vm672_vm0, %v1293_v4, %v1294_v30 }
 0x1fa   : > { %v1766_v19 = vadd.f32 %v1690_v34, %v1588_v50  ;;  %v1365_v58 = vadd.f32 %v1313_v6, %v3686_v27 }
 0x1fb   : > { %2278 = vst [vmem:[%s3789_s12 + $0x30] sm:$0xff] %v2217_v57  ;;  %v2293_v37 = vadd.f32 %v2292_v25, %v2217_v57  ;;  %v2316_v61 = vmul.f32 %v2217_v57, %v2217_v57  ;;  %v1871_v32 = vpop.f32.mrf.mxu3  ;;  %v1693_v42 = vpop.f32.mrf.mxu2  ;;  %v1292_v25 = vrot.slane %v3649_v14, 1 }
 0x1fc   : > { %v1921_v13 = vrot.slane %v1871_v32, 1  ;;  %v1470_v11 = vpop.f32.mrf.mxu1  ;;  %v2100_v43 = vpop.f32.mrf.mxu0 }
 0x1fd   : > { %v2331_v56 = vadd.f32 %v2330_v36, %v2316_v61  ;;  %v1518_v24 = vrot.slane %v1470_v11, 2  ;;  %v1314_v46 = vsel %vm672_vm0, %v1292_v25, %v1293_v4  ;;  %v2148_v29 = vrot.slane %v2100_v43, 2 }
 0x1fe   : > { %v1946_v20 = vsel %vm672_vm0, %v1920_v45, %v1921_v13  ;;  %v1364_v7 = vadd.f32 %v1314_v46, %v3675_v8  ;;  %v1296_v25 = vrot.slane %v3688_v52, 1  ;;  %v1297_v52 = vrot.slane %v3694_v40, 1 }
 0x1ff   : > { %v1992_v41 = vadd.f32 %v1946_v20, %v1766_v19 }
 0x201   : > { %v2218_v18 = vadd.f32 %v2172_v22, %v1992_v41 }
 0x203   : > { %2279 = vst [vmem:[%s3789_s12 + $0x38] sm:$0xff] %v2218_v18  ;;  %v2294_v26 = vadd.f32 %v2293_v37, %v2218_v18  ;;  %v2317_v2 = vmul.f32 %v2218_v18, %v2218_v18  ;;  %v1874_v39 = vpop.f32.mrf.mxu3  ;;  %v1696_v5 = vpop.f32.mrf.mxu2  ;;  %v1295_v18 = vrot.slane %v3679_v15, 1 }
 0x204   : > { %v1473_v9 = vpop.f32.mrf.mxu1  ;;  %v2103_v36 = vpop.f32.mrf.mxu0  ;;  %v1922_v45 = vrot.slane %v1874_v39, 1 }
 0x205   : > { %v2332_v44 = vadd.f32 %v2331_v56, %v2317_v2  ;;  %v1519_v23 = vrot.slane %v1473_v9, 2  ;;  %v2149_v51 = vrot.slane %v2103_v36, 2 }
 0x207   : > { %v1540_v14 = vsel %vm899_vm1, %v1518_v24, %v1519_v23  ;;  %v2170_v21 = vsel %vm899_vm1, %v2148_v29, %v2149_v51 }
 0x208   : > { %v1590_v34 = vadd.f32 %v1540_v14, %v1364_v7 }
 0x20a   : > { %v1768_v49 = vadd.f32 %v1696_v5, %v1590_v34 }
 0x20b   : > { %v1877_v17 = vpop.f32.mrf.mxu3  ;;  %v1699_v10 = vpop.f32.mrf.mxu2 }
 0x20c   : > { %v1923_v53 = vrot.slane %v1877_v17, 1  ;;  %v1476_v47 = vpop.f32.mrf.mxu1  ;;  %v2106_v28 = vpop.f32.mrf.mxu0 }
 0x20d   : > { %v1520_v33 = vrot.slane %v1476_v47, 2  ;;  %v2150_v3 = vrot.slane %v2106_v28, 2  ;;  %v1310_v28 = vsel %vm672_vm0, %v1296_v25, %v1297_v52 }
 0x20e   : > { %v1944_v8 = vsel %vm672_vm0, %v1922_v45, %v1923_v53  ;;  %v1368_v40 = vadd.f32 %v1310_v28, %v3710_v48 }
 0x20f   : > { %v1994_v59 = vadd.f32 %v1944_v8, %v1768_v49  ;;  %v1539_v55 = vsel %vm899_vm1, %v1519_v23, %v1520_v33  ;;  %v2169_v41 = vsel %vm899_vm1, %v2149_v51, %v2150_v3  ;;  %v1311_v23 = vsel %vm672_vm0, %v1295_v18, %v1296_v25 }
 0x210   : > { %v1591_v50 = vadd.f32 %v1539_v55, %v1365_v58  ;;  %v1367_v46 = vadd.f32 %v1311_v23, %v3700_v12 }
 0x211   : > { %v2220_v57 = vadd.f32 %v2170_v21, %v1994_v59 }
 0x212   : > { %v1769_v27 = vadd.f32 %v1699_v10, %v1591_v50 }
 0x213   : > { %2280 = vst [vmem:[%s3789_s12 + $0x40] sm:$0xff] %v2220_v57  ;;  %v2295_v37 = vadd.f32 %v2294_v26, %v2220_v57  ;;  %v2318_v61 = vmul.f32 %v2220_v57, %v2220_v57  ;;  %v1880_v32 = vpop.f32.mrf.mxu3  ;;  %v1702_v42 = vpop.f32.mrf.mxu2 }
 0x214   : > { %v1924_v13 = vrot.slane %v1880_v32, 1  ;;  %v1479_v11 = vpop.f32.mrf.mxu1  ;;  %v2109_v43 = vpop.f32.mrf.mxu0 }
 0x215   : > { %v2333_v56 = vadd.f32 %v2332_v44, %v2318_v61  ;;  %v1521_v44 = vrot.slane %v1479_v11, 2  ;;  %v2151_v30 = vrot.slane %v2109_v43, 2 }
 0x216   : > { %v1943_v19 = vsel %vm672_vm0, %v1923_v53, %v1924_v13 }
 0x217   : > { %v1995_v20 = vadd.f32 %v1943_v19, %v1769_v27  ;;  %v1299_v27 = vrot.slane %v3712_v35, 1  ;;  %v1300_v35 = vrot.slane %v3719_v16, 1 }
 0x219   : > { %v2221_v22 = vadd.f32 %v2169_v41, %v1995_v20 }
 0x21b   : > { %2281 = vst [vmem:[%s3789_s12 + $0x48] sm:$0xff] %v2221_v22  ;;  %v2296_v4 = vadd.f32 %v2295_v37, %v2221_v22  ;;  %v2319_v26 = vmul.f32 %v2221_v22, %v2221_v22  ;;  %v1883_v2 = vpop.f32.mrf.mxu3  ;;  %v1705_v39 = vpop.f32.mrf.mxu2 }
 0x21c   : > { %v1482_v5 = vpop.f32.mrf.mxu1  ;;  %v2112_v9 = vpop.f32.mrf.mxu0  ;;  %v1925_v17 = vrot.slane %v1883_v2, 1 }
 0x21d   : > { %v2334_v36 = vadd.f32 %v2333_v56, %v2319_v26  ;;  %v1522_v24 = vrot.slane %v1482_v5, 2  ;;  %v2152_v10 = vrot.slane %v2112_v9, 2  ;;  %v1298_v56 = vrot.slane %v3704_v38, 1 }
 0x21f   : > { %v1537_v15 = vsel %vm899_vm1, %v1521_v44, %v1522_v24  ;;  %v2167_v8 = vsel %vm899_vm1, %v2151_v30, %v2152_v10  ;;  %v1307_v30 = vsel %vm672_vm0, %v1299_v27, %v1300_v35 }
 0x220   : > { %v1593_v7 = vadd.f32 %v1537_v15, %v1367_v46  ;;  %v1371_v16 = vadd.f32 %v1307_v30, %v3735_v60 }
 0x222   : > { %v1771_v53 = vadd.f32 %v1705_v39, %v1593_v7  ;;  %v1308_v39 = vsel %vm672_vm0, %v1298_v56, %v1299_v27 }
 0x223   : > { %v1886_v14 = vpop.f32.mrf.mxu3  ;;  %v1708_v34 = vpop.f32.mrf.mxu2  ;;  %v1370_v5 = vadd.f32 %v1308_v39, %v3725_v1 }
 0x224   : > { %v1926_v29 = vrot.slane %v1886_v14, 1  ;;  %v1485_v45 = vpop.f32.mrf.mxu1  ;;  %v2115_v51 = vpop.f32.mrf.mxu0 }
 0x225   : > { %v1523_v47 = vrot.slane %v1485_v45, 2  ;;  %v2153_v50 = vrot.slane %v2115_v51, 2 }
 0x226   : > { %v1941_v12 = vsel %vm672_vm0, %v1925_v17, %v1926_v29 }
 0x227   : > { %v1997_v49 = vadd.f32 %v1941_v12, %v1771_v53  ;;  %v1536_v33 = vsel %vm899_vm1, %v1522_v24, %v1523_v47  ;;  %v2166_v11 = vsel %vm899_vm1, %v2152_v10, %v2153_v50  ;;  %v1302_v50 = vrot.slane %v3737_v62, 1 }
 0x228   : > { %v1594_v59 = vadd.f32 %v1536_v33, %v1368_v40  ;;  %v1303_v62 = vrot.slane %v3743_v63, 1 }
 0x229   : > { %v2223_v6 = vadd.f32 %v2167_v8, %v1997_v49 }
 0x22a   : > { %v1772_v48 = vadd.f32 %v1708_v34, %v1594_v59 }
 0x22b   : > { %2282 = vst [vmem:[%s3789_s12 + $0x50] sm:$0xff] %v2223_v6  ;;  %v2297_v58 = vadd.f32 %v2296_v4, %v2223_v6  ;;  %v2320_v55 = vmul.f32 %v2223_v6, %v2223_v6  ;;  %v1889_v21 = vpop.f32.mrf.mxu3  ;;  %v1711_v57 = vpop.f32.mrf.mxu2 }
 0x22c   : > { %v1927_v37 = vrot.slane %v1889_v21, 1  ;;  %v1488_v61 = vpop.f32.mrf.mxu1  ;;  %v2118_v32 = vpop.f32.mrf.mxu0  ;;  %v1301_v57 = vrot.slane %v3729_v54, 1 }
 0x22d   : > { %v2335_v42 = vadd.f32 %v2334_v36, %v2320_v55  ;;  %v1524_v26 = vrot.slane %v1488_v61, 2  ;;  %v2154_v24 = vrot.slane %v2118_v32, 2 }
 0x22e   : > { %v1940_v3 = vsel %vm672_vm0, %v1926_v29, %v1927_v37 }
 0x22f   : > { %v1998_v13 = vadd.f32 %v1940_v3, %v1772_v48 }
 0x231   : > { %v2224_v43 = vadd.f32 %v2166_v11, %v1998_v13 }
 0x233   : > { %2283 = vst [vmem:[%s3789_s12 + $0x58] sm:$0xff] %v2224_v43  ;;  %v2298_v19 = vadd.f32 %v2297_v58, %v2224_v43  ;;  %v2321_v20 = vmul.f32 %v2224_v43, %v2224_v43  ;;  %v1892_v41 = vpop.f32.mrf.mxu3  ;;  %v1714_v22 = vpop.f32.mrf.mxu2  ;;  %v1305_v43 = vsel %vm672_vm0, %v1301_v57, %v1302_v50 }
 0x234   : > { %v1491_v18 = vpop.f32.mrf.mxu1  ;;  %v2121_v25 = vpop.f32.mrf.mxu0  ;;  %v1928_v23 = vrot.slane %v1892_v41, 1  ;;  %v1373_v27 = vadd.f32 %v1305_v43, %v3749_v0  ;;  %v1304_v0 = vsel %vm672_vm0, %v1302_v50, %v1303_v62 }
 0x235   : > { %v2336_v4 = vadd.f32 %v2335_v42, %v2321_v20  ;;  %v1525_v2 = vrot.slane %v1491_v18, 2  ;;  %v2155_v46 = vrot.slane %v2121_v25, 2 }
 0x237   : > { %v1534_v38 = vsel %vm899_vm1, %v1524_v26, %v1525_v2  ;;  %v2164_v29 = vsel %vm899_vm1, %v2154_v24, %v2155_v46 }
 0x238   : > { %v1596_v9 = vadd.f32 %v1534_v38, %v1370_v5 }
 0x23a   : > { %v1774_v14 = vadd.f32 %v1714_v22, %v1596_v9  ;;  %v4000_v9 = vld [vmem:[#allocation3_spill] sm:$0xff] }
 0x23b   : > { %v1895_v36 = vpop.f32.mrf.mxu3  ;;  %v1717_v44 = vpop.f32.mrf.mxu2  ;;  %v1374_v35 = vadd.f32 %v1304_v0, %v4000_v9 }
 0x23c   : > { %v1929_v15 = vrot.slane %v1895_v36, 1  ;;  %v1494_v7 = vpop.f32.mrf.mxu1  ;;  %v2124_v52 = vpop.f32.mrf.mxu0 }
 0x23d   : > { %v1526_v34 = vrot.slane %v1494_v7, 2  ;;  %v2156_v49 = vrot.slane %v2124_v52, 2 }
 0x23e   : > { %v1938_v1 = vsel %vm672_vm0, %v1928_v23, %v1929_v15 }
 0x23f   : > { %v2000_v17 = vadd.f32 %v1938_v1, %v1774_v14  ;;  %v1533_v10 = vsel %vm899_vm1, %v1525_v2, %v1526_v34  ;;  %v2163_v55 = vsel %vm899_vm1, %v2155_v46, %v2156_v49 }
 0x240   : > { %v1597_v51 = vadd.f32 %v1533_v10, %v1371_v16 }
 0x241   : > { %v2226_v45 = vadd.f32 %v2164_v29, %v2000_v17 }
 0x242   : > { %v1775_v6 = vadd.f32 %v1717_v44, %v1597_v51 }
 0x243   : > { %2284 = vst [vmem:[%s3789_s12 + $0x60] sm:$0xff] %v2226_v45  ;;  %v2299_v53 = vadd.f32 %v2298_v19, %v2226_v45  ;;  %v2322_v47 = vmul.f32 %v2226_v45, %v2226_v45  ;;  %v1898_v12 = vpop.f32.mrf.mxu3  ;;  %v1720_v28 = vpop.f32.mrf.mxu2 }
 0x244   : > { %v1930_v40 = vrot.slane %v1898_v12, 1  ;;  %v1497_v33 = vpop.f32.mrf.mxu1  ;;  %v2127_v60 = vpop.f32.mrf.mxu0 }
 0x245   : > { %v2337_v8 = vadd.f32 %v2336_v4, %v2322_v47  ;;  %v1527_v13 = vrot.slane %v1497_v33, 2  ;;  %v2157_v22 = vrot.slane %v2127_v60, 2 }
 0x246   : > { %v1937_v59 = vsel %vm672_vm0, %v1929_v15, %v1930_v40 }
 0x247   : > { %v2001_v58 = vadd.f32 %v1937_v59, %v1775_v6 }
 0x249   : > { %v2227_v21 = vadd.f32 %v2163_v55, %v2001_v58 }
 0x24b   : > { %2285 = vst [vmem:[%s3789_s12 + $0x68] sm:$0xff] %v2227_v21  ;;  %v2300_v37 = vadd.f32 %v2299_v53, %v2227_v21  ;;  %v2323_v61 = vmul.f32 %v2227_v21, %v2227_v21  ;;  %v1901_v32 = vpop.f32.mrf.mxu3  ;;  %v1723_v42 = vpop.f32.mrf.mxu2 }
 0x24c   : > { %v1500_v48 = vpop.f32.mrf.mxu1  ;;  %v2130_v56 = vpop.f32.mrf.mxu0  ;;  %v1931_v18 = vrot.slane %v1901_v32, 1 }
 0x24d   : > { %v2338_v3 = vadd.f32 %v2337_v8, %v2323_v61  ;;  %v1528_v11 = vrot.slane %v1500_v48, 2  ;;  %v2158_v25 = vrot.slane %v2130_v56, 2 }
 0x24f   : > { %v1531_v54 = vsel %vm899_vm1, %v1527_v13, %v1528_v11  ;;  %v2161_v36 = vsel %vm899_vm1, %v2157_v22, %v2158_v25 }
 0x250   : > { %v1599_v19 = vadd.f32 %v1531_v54, %v1373_v27 }
 0x252   : > { %v1777_v2 = vadd.f32 %v1723_v42, %v1599_v19 }
 0x253   : > { %v1904_v20 = vpop.f32.mrf.mxu3  ;;  %v1726_v41 = vpop.f32.mrf.mxu2 }
 0x254   : > { %v1932_v4 = vrot.slane %v1904_v20, 1  ;;  %v1503_v26 = vpop.f32.mrf.mxu1  ;;  %v2133_v24 = vpop.f32.mrf.mxu0 }
 0x255   : > { %v1529_v39 = vrot.slane %v1503_v26, 2  ;;  %v2159_v14 = vrot.slane %v2133_v24, 2 }
 0x256   : > { %v1935_v5 = vsel %vm672_vm0, %v1931_v18, %v1932_v4 }
 0x257   : > { %v2003_v38 = vadd.f32 %v1935_v5, %v1777_v2  ;;  %v1530_v63 = vsel %vm899_vm1, %v1528_v11, %v1529_v39  ;;  %v2160_v10 = vsel %vm899_vm1, %v2158_v25, %v2159_v14 }
 0x258   : > { %v1600_v23 = vadd.f32 %v1530_v63, %v1374_v35 }
 0x259   : > { %v2229_v44 = vadd.f32 %v2161_v36, %v2003_v38 }
 0x25a   : > { %v1778_v30 = vadd.f32 %v1726_v41, %v1600_v23 }
 0x25b   : > { %2286 = vst [vmem:[%s3789_s12 + $0x70] sm:$0xff] %v2229_v44  ;;  %v2301_v46 = vadd.f32 %v2300_v37, %v2229_v44  ;;  %v2324_v15 = vmul.f32 %v2229_v44, %v2229_v44  ;;  %v1907_v7 = vpop.f32.mrf.mxu3  ;;  %v1729_v52 = vpop.f32.mrf.mxu2 }
 0x25c   : > { %v1933_v34 = vrot.slane %v1907_v7, 1 }
 0x25d   : > { %v2339_v1 = vadd.f32 %v2338_v3, %v2324_v15 }
 0x25e   : > { %v1934_v17 = vsel %vm672_vm0, %v1932_v4, %v1933_v34 }
 0x25f   : > { %v2004_v16 = vadd.f32 %v1934_v17, %v1778_v30 }
 0x261   : > { %v2230_v29 = vadd.f32 %v2160_v10, %v2004_v16 }
 0x263   : > { %2287 = vst [vmem:[%s3789_s12 + $0x78] sm:$0xff] %v2230_v29  ;;  %v2302_v45 = vadd.f32 %v2301_v46, %v2230_v29  ;;  %v2325_v51 = vmul.f32 %v2230_v29, %v2230_v29 }
 0x265   : > { %v2303_v53 = vrot.slane %v2302_v45, 4  ;;  %v2340_v47 = vadd.f32 %v2339_v1, %v2325_v51 }
 0x267   : > { %v2304_v12 = vadd.f32 %v2303_v53, %v2302_v45  ;;  %v2341_v28 = vrot.slane %v2340_v47, 4 }
 0x269   : > { %v2305_v49 = vrot.slane %v2304_v12, 2  ;;  %v2342_v40 = vadd.f32 %v2341_v28, %v2340_v47 }
 0x26b   : > { %v2306_v33 = vadd.f32 %v2305_v49, %v2304_v12  ;;  %v2343_v8 = vrot.slane %v2342_v40, 2 }
 0x26d   : > { %v2307_v6 = vrot.slane %v2306_v33, 1  ;;  %v2344_v31 = vadd.f32 %v2343_v8, %v2342_v40 }
 0x26f   : > { %v2308_v60 = vadd.f32 %v2307_v6, %v2306_v33  ;;  %v2345_v59 = vrot.slane %v2344_v31, 1 }
 0x271   : > { %2309 = vst [vmem:[%s308_s27] sm:$0x1] %v2308_v60  ;;  %v2346_v58 = vadd.f32 %v2345_v59, %v2344_v31 }
 0x273   : > { %2347 = vst [vmem:[%s308_s27 + $0x1] sm:$0x1] %v2346_v58 }
 0x274 PF: > { %s15_s19 = sadd.s32 1, %s2806_s19   ;;  %s4001_s15 = smov %s2798_s17 }
 0x275   : > { %p12_p10 = scmp.ge.s32.totalorder %s15_s19, 6   ;;  %s4002_s16 = smov %s2802_s18 }
 0x276   : > { %s4003_s17 = smov %s4006_s20  ;;  %s4004_s18 = smov %s4010_s21 }
 0x277   :  { %14 = sbr.rel (!%p12_p10) target bundleno = 3 (0x3), region = 85 }

</bundles_post_ra>
